<compile_context>
chip_gen: v7x
topology: tpu7x:2x2x1
jax: 0.10.0
libtpu: 0.0.40
codegen_flags: <defaults>
</compile_context>

<pallas_src>
import functools

import jax
import jax.numpy as jnp
from jax import lax
from jax.experimental import pallas as pl
from jax.experimental.pallas import tpu as pltpu


# ---------------------------------------------------------------------------
# Kernels
# ---------------------------------------------------------------------------

def _corr_sumsq_kernel(hi_ref, hk_ref, out_ref, acc_ref):
    """Accumulate sum_j corr[i, j]^2 over contraction tiles k (corr = h h^T)."""
    k = pl.program_id(1)

    @pl.when(k == 0)
    def _():
        acc_ref[...] = jnp.zeros_like(acc_ref)

    # Contract on the last axis of both operands -> no explicit transpose.
    corr = lax.dot_general(
        hi_ref[...], hk_ref[...],
        dimension_numbers=(((1,), (1,)), ((), ())),
        preferred_element_type=jnp.float32)
    acc_ref[...] += jnp.sum(corr * corr, axis=1, keepdims=True)

    @pl.when(k == pl.num_programs(1) - 1)
    def _():
        out_ref[...] = acc_ref[...]


def _fuse_a_kernel(a_ref, hi_ref, hk_ref, ss_ref, out_ref):
    """A'[i, k] = A[i, k] + corr[i, k] * rsqrt(sum_j corr[i, j]^2)."""
    corr = lax.dot_general(
        hi_ref[...], hk_ref[...],
        dimension_numbers=(((1,), (1,)), ((), ())),
        preferred_element_type=jnp.float32)
    ss = ss_ref[...]
    # rsqrt goes to the EUP slot (free next to the MXU/VPU work).  Guard so
    # padded (all-zero) rows get 0 instead of inf/NaN; the PyTorch reference
    # would NaN on an exactly-zero correlation row.
    inv = jnp.where(ss > 0.0, lax.rsqrt(ss), 0.0)
    out_ref[...] = a_ref[...] + corr * inv


def _hw_kernel(h_ref, wht_ref, hw0_ref, hw12_ref):
    """hw = hidden @ [wh0|wh1|wh2]^T as one wide GEMM; split into hw0 / hw12."""
    hp = hw0_ref.shape[-1]
    hw = jnp.dot(h_ref[...], wht_ref[...], preferred_element_type=jnp.float32)
    hw0_ref[...] = hw[:, :hp]
    hw12_ref[...] = hw[:, hp:]


def _gate_kernel(a_ref, hw0_ref, hw12_ref, whft_ref, h_out_ref, m_acc_ref):
    """m = A' @ hw0 (tiled reduction); hf = m @ [whf0|whf1]^T; gate epilogue."""
    k = pl.program_id(1)

    @pl.when(k == 0)
    def _():
        m_acc_ref[...] = jnp.zeros_like(m_acc_ref)

    m_acc_ref[...] += jnp.dot(a_ref[...], hw0_ref[...],
                              preferred_element_type=jnp.float32)

    @pl.when(k == pl.num_programs(1) - 1)
    def _():
        hp = h_out_ref.shape[-1]
        hf = jnp.dot(m_acc_ref[...], whft_ref[...],
                     preferred_element_type=jnp.float32)
        hf0, hf1 = hf[:, :hp], hf[:, hp:]
        hw12 = hw12_ref[...]
        hw1, hw2 = hw12[:, :hp], hw12[:, hp:]
        gate = jnp.maximum(hf0 + hw1, 0.0)
        h_out_ref[...] = (hw2 + gate * hf1).astype(h_out_ref.dtype)


# ---------------------------------------------------------------------------
# Wrapper
# ---------------------------------------------------------------------------

def _round_up(x, m):
    return ((x + m - 1) // m) * m


def _pick_tile(n, max_tile):
    for c in (512, 256, 128):
        if c <= max_tile and n % c == 0:
            return c
    return 128  # n is always a multiple of 128 here


@functools.partial(jax.jit, static_argnames=("fuse_A", "step", "tm", "tk"))
def global_gnn_forward(A_Global, hidden, w_h, w_hf, *,
                       fuse_A=True, step=1, tm=256, tk=512):
    f32 = jnp.float32
    N, H = hidden.shape
    assert A_Global.shape == (N, N)
    assert w_h.shape == (3 * H, H) and w_hf.shape == (2 * H, H)

    Hp = _round_up(H, 128)          # lane-dense hidden dimension
    Np = _round_up(N, 128)          # padded node count
    TM = _pick_tile(Np, tm)         # row tile (sublanes)
    TK = _pick_tile(Np, tk)         # contraction / A-column tile
    gi, gk = Np // TM, Np // TK

    # ---- pad inputs / pre-transpose + concatenate weights (wide GEMMs) ----
    A_p = jnp.pad(A_Global.astype(f32), ((0, Np - N), (0, Np - N)))
    h_p = jnp.pad(hidden.astype(f32), ((0, Np - N), (0, Hp - H)))

    def _pad_t(w):  # (H, H) chunk -> padded (Hp, Hp) transpose
        return jnp.pad(w.astype(f32).T, ((0, Hp - H), (0, Hp - H)))

    wht = jnp.concatenate(
        [_pad_t(w_h[0:H]), _pad_t(w_h[H:2 * H]), _pad_t(w_h[2 * H:3 * H])],
        axis=1)                                         # (Hp, 3Hp)
    whft = jnp.concatenate(
        [_pad_t(w_hf[0:H]), _pad_t(w_hf[H:2 * H])], axis=1)   # (Hp, 2Hp)

    # ---- optional fuse_A: A' = A + (h h^T) / ||h h^T||_row2, tile-wise ----
    if fuse_A:
        sumsq = pl.pallas_call(
            _corr_sumsq_kernel,
            out_shape=jax.ShapeDtypeStruct((Np, 1), f32),
            grid_spec=pltpu.PrefetchScalarGridSpec(
                num_scalar_prefetch=0, grid=(gi, gk),
                in_specs=[pl.BlockSpec((TM, Hp), lambda i, k: (i, 0)),
                          pl.BlockSpec((TK, Hp), lambda i, k: (k, 0))],
                out_specs=pl.BlockSpec((TM, 1), lambda i, k: (i, 0)),
                scratch_shapes=[pltpu.VMEM((TM, 1), f32)]),
            compiler_params=pltpu.CompilerParams(
                dimension_semantics=("parallel", "arbitrary")),
        )(h_p, h_p)

        A_p = pl.pallas_call(
            _fuse_a_kernel,
            out_shape=jax.ShapeDtypeStruct((Np, Np), f32),
            grid_spec=pltpu.PrefetchScalarGridSpec(
                num_scalar_prefetch=0, grid=(gi, gk),
                in_specs=[pl.BlockSpec((TM, TK), lambda i, k: (i, k)),
                          pl.BlockSpec((TM, Hp), lambda i, k: (i, 0)),
                          pl.BlockSpec((TK, Hp), lambda i, k: (k, 0)),
                          pl.BlockSpec((TM, 1), lambda i, k: (i, 0))],
                out_specs=pl.BlockSpec((TM, TK), lambda i, k: (i, k))),
            compiler_params=pltpu.CompilerParams(
                dimension_semantics=("parallel", "parallel")),
        )(A_p, h_p, h_p, sumsq)

    # ---- per-step kernels ----
    hw_call = pl.pallas_call(
        _hw_kernel,
        out_shape=(jax.ShapeDtypeStruct((Np, Hp), f32),
                   jax.ShapeDtypeStruct((Np, 2 * Hp), f32)),
        grid_spec=pltpu.PrefetchScalarGridSpec(
            num_scalar_prefetch=0, grid=(gi,),
            in_specs=[pl.BlockSpec((TM, Hp), lambda i: (i, 0)),
                      pl.BlockSpec((Hp, 3 * Hp), lambda i: (0, 0))],
            out_specs=(pl.BlockSpec((TM, Hp), lambda i: (i, 0)),
                       pl.BlockSpec((TM, 2 * Hp), lambda i: (i, 0)))),
        compiler_params=pltpu.CompilerParams(
            dimension_semantics=("parallel",)),
    )

    gate_cost = pl.CostEstimate(
        flops=2 * Np * Np * Hp + 4 * Np * Hp * Hp + 4 * Np * Hp,
        transcendentals=0,
        bytes_accessed=4 * (Np * Np + 4 * Np * Hp + 2 * Hp * Hp))

    gate_call = pl.pallas_call(
        _gate_kernel,
        out_shape=jax.ShapeDtypeStruct((Np, Hp), f32),
        grid_spec=pltpu.PrefetchScalarGridSpec(
            num_scalar_prefetch=0, grid=(gi, gk),
            in_specs=[pl.BlockSpec((TM, TK), lambda i, k: (i, k)),
                      pl.BlockSpec((TK, Hp), lambda i, k: (k, 0)),
                      pl.BlockSpec((TM, 2 * Hp), lambda i, k: (i, 0)),
                      pl.BlockSpec((Hp, 2 * Hp), lambda i, k: (0, 0))],
            out_specs=pl.BlockSpec((TM, Hp), lambda i, k: (i, 0)),
            scratch_shapes=[pltpu.VMEM((TM, Hp), f32)]),
        compiler_params=pltpu.CompilerParams(
            dimension_semantics=("parallel", "arbitrary")),
        cost_estimate=gate_cost,
    )

    # ---- step loop (Python unroll; step is small.  Each step needs the full
    #      previous hidden, so steps cannot be folded into one grid axis.) ----
    h_cur = h_p
    acc = jnp.zeros((Np, Hp), f32)
    for _ in range(step):
        hw0, hw12 = hw_call(h_cur, wht)          # stage hw once per step
        h_cur = gate_call(A_p, hw0, hw12, whft)  # tiled A' @ hw0 + gate
        acc = acc + h_cur

    h_out = h_cur[:N, :H]
    mean_out = (acc * (1.0 / float(step)))[:N, :H]
    return h_out, mean_out


# ---------------------------------------------------------------------------
# Pure-JAX reference (mirrors the PyTorch module exactly)
# ---------------------------------------------------------------------------

def _reference_forward(A_Global, hidden, w_h, w_hf, *, fuse_A=True, step=1):
    H = hidden.shape[-1]
    if fuse_A:
        corr = hidden @ hidden.T
        std = jnp.linalg.norm(corr, ord=2, axis=1, keepdims=True)
        A_Global = A_Global + corr / std
    seqs = []
    for _ in range(step):
        hw = hidden @ w_h.T
        hw0, hw1, hw2 = hw[:, :H], hw[:, H:2 * H], hw[:, 2 * H:]
        hf = (A_Global @ hw0) @ w_hf.T
        hf0, hf1 = hf[:, :H], hf[:, H:]
        gate = jnp.maximum(hf0 + hw1, 0.0)
        hidden = hw2 + gate * hf1
        seqs.append(hidden)
    return hidden, jnp.mean(jnp.stack(seqs, axis=1), axis=1)


if __name__ == "__main__":
    # Small, forward-consistent shapes: N nodes, hidden_size H.
    N, H = 16, 32
    fuse_A, step = True, 2

    key = jax.random.PRNGKey(0)
    k_a, k_h, k_wh, k_whf = jax.random.split(key, 4)

    A_Global = jax.random.normal(k_a, (N, N), dtype=jnp.float32)
    hidden = jax.random.normal(k_h, (N, H), dtype=jnp.float32)

    # PyTorch-style uniform(-1/sqrt(H), 1/sqrt(H)) parameter init.
    stdv = 1.0 / (H ** 0.5)
    w_h = jax.random.uniform(k_wh, (3 * H, H), dtype=jnp.float32,
                             minval=-stdv, maxval=stdv)
    w_hf = jax.random.uniform(k_whf, (2 * H, H), dtype=jnp.float32,
                              minval=-stdv, maxval=stdv)

    h_out, mean_out = global_gnn_forward(A_Global, hidden, w_h, w_hf,
                                         fuse_A=fuse_A, step=step)
    jax.block_until_ready((h_out, mean_out))

    h_ref, mean_ref = _reference_forward(A_Global, hidden, w_h, w_hf,
                                         fuse_A=fuse_A, step=step)
    assert jnp.allclose(h_out, h_ref, atol=1e-4, rtol=1e-4)
    assert jnp.allclose(mean_out, mean_ref, atol=1e-4, rtol=1e-4)

    print("KERNEL_OK")
</pallas_src>

<mosaic_0001>
module attributes {stable_mosaic.version = 11 : i64} {
  func.func @_corr_sumsq_kernel(%arg0: i32, %arg1: i32, %arg2: memref<128x128xf32, #tpu.memory_space<vmem>>, %arg3: memref<128x128xf32, #tpu.memory_space<vmem>>, %arg4: memref<128x1xf32, #tpu.memory_space<vmem>>, %arg5: memref<128x1xf32, #tpu.memory_space<vmem>>) attributes {dimension_semantics = [#tpu.dimension_semantics<parallel>, #tpu.dimension_semantics<arbitrary>], iteration_bounds = array<i64: 1, 1>, scalar_prefetch = 0 : i64, scratch_operands = 1 : i64, tpu.core_type = #tpu.core_type<tc>, window_params = [{transform_indices = @transform_0, window_bounds = array<i64: 128, 128>}, {transform_indices = @transform_1, window_bounds = array<i64: 128, 128>}, {transform_indices = @transform_2, window_bounds = array<i64: 128, 1>}]} {
    %c0_i32 = arith.constant 0 : i32
    %0 = arith.cmpi eq, %arg1, %c0_i32 : i32
    %1 = arith.extui %0 : i1 to i32
    %c0_i32_0 = arith.constant 0 : i32
    %2 = arith.cmpi ne, %1, %c0_i32_0 : i32
    scf.if %2 {
      %cst_11 = arith.constant 0.000000e+00 : f32
      %15 = vector.broadcast %cst_11 : f32 to vector<128x1xf32>
      %c0_12 = arith.constant 0 : index
      %c0_13 = arith.constant 0 : index
      %16 = vector.load %arg5[%c0_12, %c0_13] : memref<128x1xf32, #tpu.memory_space<vmem>>, vector<128x1xf32>
      tpu.vector_store %arg5[%c0_12, %c0_13], %15 {strides = array<i32>} : memref<128x1xf32, #tpu.memory_space<vmem>>, vector<128x1xf32>,
    } else {
    }
    %c0 = arith.constant 0 : index
    %c0_1 = arith.constant 0 : index
    %3 = vector.load %arg2[%c0, %c0_1] : memref<128x128xf32, #tpu.memory_space<vmem>>, vector<128x128xf32>
    %c0_2 = arith.constant 0 : index
    %c0_3 = arith.constant 0 : index
    %4 = vector.load %arg3[%c0_2, %c0_3] : memref<128x128xf32, #tpu.memory_space<vmem>>, vector<128x128xf32>
    %cst = arith.constant dense<0.000000e+00> : vector<128x128xf32>
    %5 = tpu.matmul %3, %4, %cst {dimension_numbers = #tpu.dot_dimension_numbers<[1], [1], [0], [0], [0, 0, 1, 0], [], []>} : vector<128x128xf32>, vector<128x128xf32>, vector<128x128xf32> -> vector<128x128xf32>
    %c0_4 = arith.constant 0 : index
    %c0_5 = arith.constant 0 : index
    %6 = vector.load %arg5[%c0_4, %c0_5] : memref<128x1xf32, #tpu.memory_space<vmem>>, vector<128x1xf32>
    %7 = arith.mulf %5, %5 : vector<128x128xf32>
    %cst_6 = arith.constant dense<0.000000e+00> : vector<128xf32>
    %8 = vector.multi_reduction <add>, %7, %cst_6 [1] : vector<128x128xf32> to vector<128xf32>
    %9 = vector.shape_cast %8 : vector<128xf32> to vector<128x1xf32>
    %10 = arith.addf %6, %9 : vector<128x1xf32>
    %c0_7 = arith.constant 0 : index
    %c0_8 = arith.constant 0 : index
    %11 = vector.load %arg5[%c0_7, %c0_8] : memref<128x1xf32, #tpu.memory_space<vmem>>, vector<128x1xf32>
    tpu.vector_store %arg5[%c0_7, %c0_8], %10 {strides = array<i32>} : memref<128x1xf32, #tpu.memory_space<vmem>>, vector<128x1xf32>,
    %c0_i32_9 = arith.constant 0 : i32
    %12 = arith.cmpi eq, %arg1, %c0_i32_9 : i32
    %13 = arith.extui %12 : i1 to i32
    %c0_i32_10 = arith.constant 0 : i32
    %14 = arith.cmpi ne, %13, %c0_i32_10 : i32
    scf.if %14 {
      %c0_11 = arith.constant 0 : index
      %c0_12 = arith.constant 0 : index
      %15 = vector.load %arg5[%c0_11, %c0_12] : memref<128x1xf32, #tpu.memory_space<vmem>>, vector<128x1xf32>
      %c0_13 = arith.constant 0 : index
      %c0_14 = arith.constant 0 : index
      %16 = vector.load %arg4[%c0_13, %c0_14] : memref<128x1xf32, #tpu.memory_space<vmem>>, vector<128x1xf32>
      tpu.vector_store %arg4[%c0_13, %c0_14], %15 {strides = array<i32>} : memref<128x1xf32, #tpu.memory_space<vmem>>, vector<128x1xf32>,
    } else {
    }
    return
  }
  func.func @transform_0(%arg0: i32, %arg1: i32) -> (i32, i32) {
    %c0_i32 = arith.constant 0 : i32
    %c0_i32_0 = arith.constant 0 : i32
    return %arg0, %c0_i32 : i32, i32
  }
  func.func @transform_1(%arg0: i32, %arg1: i32) -> (i32, i32) {
    %c0_i32 = arith.constant 0 : i32
    %c0_i32_0 = arith.constant 0 : i32
    return %arg1, %c0_i32 : i32, i32
  }
  func.func @transform_2(%arg0: i32, %arg1: i32) -> (i32, i32) {
    %c0_i32 = arith.constant 0 : i32
    %c0_i32_0 = arith.constant 0 : i32
    return %arg0, %c0_i32 : i32, i32
  }
}

module attributes {stable_mosaic.version = 11 : i64} {
  func.func @_fuse_a_kernel(%arg0: i32, %arg1: i32, %arg2: memref<128x128xf32, #tpu.memory_space<vmem>>, %arg3: memref<128x128xf32, #tpu.memory_space<vmem>>, %arg4: memref<128x128xf32, #tpu.memory_space<vmem>>, %arg5: memref<128x1xf32, #tpu.memory_space<vmem>>, %arg6: memref<128x128xf32, #tpu.memory_space<vmem>>) attributes {dimension_semantics = [#tpu.dimension_semantics<parallel>, #tpu.dimension_semantics<parallel>], iteration_bounds = array<i64: 1, 1>, scalar_prefetch = 0 : i64, scratch_operands = 0 : i64, tpu.core_type = #tpu.core_type<tc>, window_params = [{transform_indices = @transform_0, window_bounds = array<i64: 128, 128>}, {transform_indices = @transform_1, window_bounds = array<i64: 128, 128>}, {transform_indices = @transform_2, window_bounds = array<i64: 128, 128>}, {transform_indices = @transform_3, window_bounds = array<i64: 128, 1>}, {transform_indices = @transform_4, window_bounds = array<i64: 128, 128>}]} {
    %c0 = arith.constant 0 : index
    %c0_0 = arith.constant 0 : index
    %0 = vector.load %arg3[%c0, %c0_0] : memref<128x128xf32, #tpu.memory_space<vmem>>, vector<128x128xf32>
    %c0_1 = arith.constant 0 : index
    %c0_2 = arith.constant 0 : index
    %1 = vector.load %arg4[%c0_1, %c0_2] : memref<128x128xf32, #tpu.memory_space<vmem>>, vector<128x128xf32>
    %cst = arith.constant dense<0.000000e+00> : vector<128x128xf32>
    %2 = tpu.matmul %0, %1, %cst {dimension_numbers = #tpu.dot_dimension_numbers<[1], [1], [0], [0], [0, 0, 1, 0], [], []>} : vector<128x128xf32>, vector<128x128xf32>, vector<128x128xf32> -> vector<128x128xf32>
    %c0_3 = arith.constant 0 : index
    %c0_4 = arith.constant 0 : index
    %3 = vector.load %arg5[%c0_3, %c0_4] : memref<128x1xf32, #tpu.memory_space<vmem>>, vector<128x1xf32>
    %cst_5 = arith.constant 0.000000e+00 : f32
    %4 = vector.broadcast %cst_5 : f32 to vector<128x1xf32>
    %5 = arith.cmpf ogt, %3, %4 : vector<128x1xf32>
    %6 = math.rsqrt %3 : vector<128x1xf32>
    %cst_6 = arith.constant 0.000000e+00 : f32
    %7 = vector.broadcast %cst_6 : f32 to vector<128x1xf32>
    %8 = arith.select %5, %6, %7 : vector<128x1xi1>, vector<128x1xf32>
    %c0_7 = arith.constant 0 : index
    %c0_8 = arith.constant 0 : index
    %9 = vector.load %arg2[%c0_7, %c0_8] : memref<128x128xf32, #tpu.memory_space<vmem>>, vector<128x128xf32>
    %10 = vector.broadcast %8 : vector<128x1xf32> to vector<128x128xf32>
    %11 = arith.mulf %2, %10 : vector<128x128xf32>
    %12 = arith.addf %9, %11 : vector<128x128xf32>
    %c0_9 = arith.constant 0 : index
    %c0_10 = arith.constant 0 : index
    %13 = vector.load %arg6[%c0_9, %c0_10] : memref<128x128xf32, #tpu.memory_space<vmem>>, vector<128x128xf32>
    tpu.vector_store %arg6[%c0_9, %c0_10], %12 {strides = array<i32>} : memref<128x128xf32, #tpu.memory_space<vmem>>, vector<128x128xf32>,
    return
  }
  func.func @transform_0(%arg0: i32, %arg1: i32) -> (i32, i32) {
    %c0_i32 = arith.constant 0 : i32
    return %arg0, %arg1 : i32, i32
  }
  func.func @transform_1(%arg0: i32, %arg1: i32) -> (i32, i32) {
    %c0_i32 = arith.constant 0 : i32
    %c0_i32_0 = arith.constant 0 : i32
    return %arg0, %c0_i32 : i32, i32
  }
  func.func @transform_2(%arg0: i32, %arg1: i32) -> (i32, i32) {
    %c0_i32 = arith.constant 0 : i32
    %c0_i32_0 = arith.constant 0 : i32
    return %arg1, %c0_i32 : i32, i32
  }
  func.func @transform_3(%arg0: i32, %arg1: i32) -> (i32, i32) {
    %c0_i32 = arith.constant 0 : i32
    %c0_i32_0 = arith.constant 0 : i32
    return %arg0, %c0_i32 : i32, i32
  }
  func.func @transform_4(%arg0: i32, %arg1: i32) -> (i32, i32) {
    %c0_i32 = arith.constant 0 : i32
    return %arg0, %arg1 : i32, i32
  }
}

module attributes {stable_mosaic.version = 11 : i64} {
  func.func @_hw_kernel(%arg0: i32, %arg1: memref<128x128xf32, #tpu.memory_space<vmem>>, %arg2: memref<128x384xf32, #tpu.memory_space<vmem>>, %arg3: memref<128x128xf32, #tpu.memory_space<vmem>>, %arg4: memref<128x256xf32, #tpu.memory_space<vmem>>) attributes {dimension_semantics = [#tpu.dimension_semantics<parallel>], iteration_bounds = array<i64: 1>, scalar_prefetch = 0 : i64, scratch_operands = 0 : i64, tpu.core_type = #tpu.core_type<tc>, window_params = [{transform_indices = @transform_0, window_bounds = array<i64: 128, 128>}, {pipeline_mode = #tpu.pipeline_mode<synchronous>, transform_indices = @transform_1, window_bounds = array<i64: 128, 384>}, {transform_indices = @transform_2, window_bounds = array<i64: 128, 128>}, {transform_indices = @transform_3, window_bounds = array<i64: 128, 256>}]} {
    %c0 = arith.constant 0 : index
    %c0_0 = arith.constant 0 : index
    %0 = vector.load %arg1[%c0, %c0_0] : memref<128x128xf32, #tpu.memory_space<vmem>>, vector<128x128xf32>
    %c0_1 = arith.constant 0 : index
    %c0_2 = arith.constant 0 : index
    %1 = vector.load %arg2[%c0_1, %c0_2] : memref<128x384xf32, #tpu.memory_space<vmem>>, vector<128x384xf32>
    %cst = arith.constant dense<0.000000e+00> : vector<128x384xf32>
    %2 = tpu.matmul %0, %1, %cst {dimension_numbers = #tpu.dot_dimension_numbers<[1], [0], [0], [1], [0, 0, 1, 1], [], []>} : vector<128x128xf32>, vector<128x384xf32>, vector<128x384xf32> -> vector<128x384xf32>
    %3 = vector.extract_strided_slice %2 {offsets = [0, 0], sizes = [128, 128], strides = [1, 1]} : vector<128x384xf32> to vector<128x128xf32>
    %c0_3 = arith.constant 0 : index
    %c0_4 = arith.constant 0 : index
    %4 = vector.load %arg3[%c0_3, %c0_4] : memref<128x128xf32, #tpu.memory_space<vmem>>, vector<128x128xf32>
    tpu.vector_store %arg3[%c0_3, %c0_4], %3 {strides = array<i32>} : memref<128x128xf32, #tpu.memory_space<vmem>>, vector<128x128xf32>,
    %5 = vector.extract_strided_slice %2 {offsets = [0, 128], sizes = [128, 256], strides = [1, 1]} : vector<128x384xf32> to vector<128x256xf32>
    %c0_5 = arith.constant 0 : index
    %c0_6 = arith.constant 0 : index
    %6 = vector.load %arg4[%c0_5, %c0_6] : memref<128x256xf32, #tpu.memory_space<vmem>>, vector<128x256xf32>
    tpu.vector_store %arg4[%c0_5, %c0_6], %5 {strides = array<i32>} : memref<128x256xf32, #tpu.memory_space<vmem>>, vector<128x256xf32>,
    return
  }
  func.func @transform_0(%arg0: i32) -> (i32, i32) {
    %c0_i32 = arith.constant 0 : i32
    %c0_i32_0 = arith.constant 0 : i32
    return %arg0, %c0_i32 : i32, i32
  }
  func.func @transform_1(%arg0: i32) -> (i32, i32) {
    %c0_i32 = arith.constant 0 : i32
    %c0_i32_0 = arith.constant 0 : i32
    %c0_i32_1 = arith.constant 0 : i32
    return %c0_i32, %c0_i32_0 : i32, i32
  }
  func.func @transform_2(%arg0: i32) -> (i32, i32) {
    %c0_i32 = arith.constant 0 : i32
    %c0_i32_0 = arith.constant 0 : i32
    return %arg0, %c0_i32 : i32, i32
  }
  func.func @transform_3(%arg0: i32) -> (i32, i32) {
    %c0_i32 = arith.constant 0 : i32
    %c0_i32_0 = arith.constant 0 : i32
    return %arg0, %c0_i32 : i32, i32
  }
}

module attributes {stable_mosaic.version = 11 : i64} {
  func.func @_gate_kernel(%arg0: i32, %arg1: i32, %arg2: memref<128x128xf32, #tpu.memory_space<vmem>>, %arg3: memref<128x128xf32, #tpu.memory_space<vmem>>, %arg4: memref<128x256xf32, #tpu.memory_space<vmem>>, %arg5: memref<128x256xf32, #tpu.memory_space<vmem>>, %arg6: memref<128x128xf32, #tpu.memory_space<vmem>>, %arg7: memref<128x128xf32, #tpu.memory_space<vmem>>) attributes {dimension_semantics = [#tpu.dimension_semantics<parallel>, #tpu.dimension_semantics<arbitrary>], iteration_bounds = array<i64: 1, 1>, scalar_prefetch = 0 : i64, scratch_operands = 1 : i64, tpu.core_type = #tpu.core_type<tc>, window_params = [{transform_indices = @transform_0, window_bounds = array<i64: 128, 128>}, {transform_indices = @transform_1, window_bounds = array<i64: 128, 128>}, {transform_indices = @transform_2, window_bounds = array<i64: 128, 256>}, {pipeline_mode = #tpu.pipeline_mode<synchronous>, transform_indices = @transform_3, window_bounds = array<i64: 128, 256>}, {transform_indices = @transform_4, window_bounds = array<i64: 128, 128>}]} {
    %c0_i32 = arith.constant 0 : i32
    %0 = arith.cmpi eq, %arg1, %c0_i32 : i32
    %1 = arith.extui %0 : i1 to i32
    %c0_i32_0 = arith.constant 0 : i32
    %2 = arith.cmpi ne, %1, %c0_i32_0 : i32
    scf.if %2 {
      %cst_10 = arith.constant 0.000000e+00 : f32
      %12 = vector.broadcast %cst_10 : f32 to vector<128x128xf32>
      %c0_11 = arith.constant 0 : index
      %c0_12 = arith.constant 0 : index
      %13 = vector.load %arg7[%c0_11, %c0_12] : memref<128x128xf32, #tpu.memory_space<vmem>>, vector<128x128xf32>
      tpu.vector_store %arg7[%c0_11, %c0_12], %12 {strides = array<i32>} : memref<128x128xf32, #tpu.memory_space<vmem>>, vector<128x128xf32>,
    } else {
    }
    %c0 = arith.constant 0 : index
    %c0_1 = arith.constant 0 : index
    %3 = vector.load %arg7[%c0, %c0_1] : memref<128x128xf32, #tpu.memory_space<vmem>>, vector<128x128xf32>
    %c0_2 = arith.constant 0 : index
    %c0_3 = arith.constant 0 : index
    %4 = vector.load %arg2[%c0_2, %c0_3] : memref<128x128xf32, #tpu.memory_space<vmem>>, vector<128x128xf32>
    %c0_4 = arith.constant 0 : index
    %c0_5 = arith.constant 0 : index
    %5 = vector.load %arg3[%c0_4, %c0_5] : memref<128x128xf32, #tpu.memory_space<vmem>>, vector<128x128xf32>
    %cst = arith.constant dense<0.000000e+00> : vector<128x128xf32>
    %6 = tpu.matmul %4, %5, %cst {dimension_numbers = #tpu.dot_dimension_numbers<[1], [0], [0], [1], [0, 0, 1, 1], [], []>} : vector<128x128xf32>, vector<128x128xf32>, vector<128x128xf32> -> vector<128x128xf32>
    %7 = arith.addf %3, %6 : vector<128x128xf32>
    %c0_6 = arith.constant 0 : index
    %c0_7 = arith.constant 0 : index
    %8 = vector.load %arg7[%c0_6, %c0_7] : memref<128x128xf32, #tpu.memory_space<vmem>>, vector<128x128xf32>
    tpu.vector_store %arg7[%c0_6, %c0_7], %7 {strides = array<i32>} : memref<128x128xf32, #tpu.memory_space<vmem>>, vector<128x128xf32>,
    %c0_i32_8 = arith.constant 0 : i32
    %9 = arith.cmpi eq, %arg1, %c0_i32_8 : i32
    %10 = arith.extui %9 : i1 to i32
    %c0_i32_9 = arith.constant 0 : i32
    %11 = arith.cmpi ne, %10, %c0_i32_9 : i32
    scf.if %11 {
      %c0_10 = arith.constant 0 : index
      %c0_11 = arith.constant 0 : index
      %12 = vector.load %arg7[%c0_10, %c0_11] : memref<128x128xf32, #tpu.memory_space<vmem>>, vector<128x128xf32>
      %c0_12 = arith.constant 0 : index
      %c0_13 = arith.constant 0 : index
      %13 = vector.load %arg5[%c0_12, %c0_13] : memref<128x256xf32, #tpu.memory_space<vmem>>, vector<128x256xf32>
      %cst_14 = arith.constant dense<0.000000e+00> : vector<128x256xf32>
      %14 = tpu.matmul %12, %13, %cst_14 {dimension_numbers = #tpu.dot_dimension_numbers<[1], [0], [0], [1], [0, 0, 1, 1], [], []>} : vector<128x128xf32>, vector<128x256xf32>, vector<128x256xf32> -> vector<128x256xf32>
      %15 = vector.extract_strided_slice %14 {offsets = [0, 0], sizes = [128, 128], strides = [1, 1]} : vector<128x256xf32> to vector<128x128xf32>
      %16 = vector.extract_strided_slice %14 {offsets = [0, 128], sizes = [128, 128], strides = [1, 1]} : vector<128x256xf32> to vector<128x128xf32>
      %c0_15 = arith.constant 0 : index
      %c0_16 = arith.constant 0 : index
      %17 = vector.load %arg4[%c0_15, %c0_16] : memref<128x256xf32, #tpu.memory_space<vmem>>, vector<128x256xf32>
      %18 = vector.extract_strided_slice %17 {offsets = [0, 0], sizes = [128, 128], strides = [1, 1]} : vector<128x256xf32> to vector<128x128xf32>
      %19 = vector.extract_strided_slice %17 {offsets = [0, 128], sizes = [128, 128], strides = [1, 1]} : vector<128x256xf32> to vector<128x128xf32>
      %20 = arith.addf %15, %18 : vector<128x128xf32>
      %cst_17 = arith.constant 0.000000e+00 : f32
      %21 = vector.broadcast %cst_17 : f32 to vector<128x128xf32>
      %22 = arith.maximumf %20, %21 : vector<128x128xf32>
      %23 = arith.mulf %22, %16 : vector<128x128xf32>
      %24 = arith.addf %19, %23 : vector<128x128xf32>
      %c0_18 = arith.constant 0 : index
      %c0_19 = arith.constant 0 : index
      %25 = vector.load %arg6[%c0_18, %c0_19] : memref<128x128xf32, #tpu.memory_space<vmem>>, vector<128x128xf32>
      tpu.vector_store %arg6[%c0_18, %c0_19], %24 {strides = array<i32>} : memref<128x128xf32, #tpu.memory_space<vmem>>, vector<128x128xf32>,
    } else {
    }
    return
  }
  func.func @transform_0(%arg0: i32, %arg1: i32) -> (i32, i32) {
    %c0_i32 = arith.constant 0 : i32
    return %arg0, %arg1 : i32, i32
  }
  func.func @transform_1(%arg0: i32, %arg1: i32) -> (i32, i32) {
    %c0_i32 = arith.constant 0 : i32
    %c0_i32_0 = arith.constant 0 : i32
    return %arg1, %c0_i32 : i32, i32
  }
  func.func @transform_2(%arg0: i32, %arg1: i32) -> (i32, i32) {
    %c0_i32 = arith.constant 0 : i32
    %c0_i32_0 = arith.constant 0 : i32
    return %arg0, %c0_i32 : i32, i32
  }
  func.func @transform_3(%arg0: i32, %arg1: i32) -> (i32, i32) {
    %c0_i32 = arith.constant 0 : i32
    %c0_i32_0 = arith.constant 0 : i32
    %c0_i32_1 = arith.constant 0 : i32
    return %c0_i32, %c0_i32_0 : i32, i32
  }
  func.func @transform_4(%arg0: i32, %arg1: i32) -> (i32, i32) {
    %c0_i32 = arith.constant 0 : i32
    %c0_i32_0 = arith.constant 0 : i32
    return %arg0, %c0_i32 : i32, i32
  }
}

</mosaic_0001>

<bundles_post_ra>
// kernel: global_gnn_forward.7
= control target key start
LH: loop header
LB: loop body
LE: loop exit
PB: predicated region body
PF: predicated region fallthrough
CT: control target
= control target key end

     0   :  { %v577_v3 = vmov 0   ;;  %s853_s2 = inlined_call_operand.vmem [shape: f32[128,128], index: 2, kind: input, shape index: {}, may-alias: {1,2}]   ;;  %s854_s1 = inlined_call_operand.vmem [shape: f32[128,128], index: 1, kind: input, shape index: {}, may-alias: {1,2}]   ;;  %s855_s3 = inlined_call_operand.vmem [shape: f32[128,1], index: 3, kind: input, shape index: {}]   ;;  %s856_s0 = inlined_call_operand.vmem [shape: f32[128,128], index: 0, kind: input, shape index: {}]   ;;  %s857_s4 = inlined_call_operand.vmem [shape: f32[128,128], index: 4, kind: output, shape index: {}]  }
   0x1   :  { %v33_v0 = vld [vmem:[%s853_s2] sm:$0xff]  ;;  %v34_v1 = vld [vmem:[%s853_s2 + $0x8] sm:$0xff]  ;;  %v35_v2 = vld [vmem:[%s853_s2 + $0x10] sm:$0xff]  ;;  %544 = vset.pattern.permute.xlu1 %v577_v3  ;;  %543 = vset.pattern.permute.xlu0 %v577_v3 }
   0x2   :  { %v494_v4 = vpack.c.bf16 %v34_v1, %v33_v0  ;;  %v36_v5 = vld [vmem:[%s853_s2 + $0x18] sm:$0xff]  ;;  %v17_v7 = vld [vmem:[%s854_s1] sm:$0xff]  ;;  %v38_v10 = vld [vmem:[%s853_s2 + $0x28] sm:$0xff] }
   0x3   :  { %v498_v6 = vpack.c.bf16 %v36_v5, %v35_v2  ;;  %v25_v8 = vld [vmem:[%s854_s1 + $0x40] sm:$0xff]  ;;  %470 = vmatprep.mubr.f32.mxu0 %v17_v7  ;;  %v196_v12 = vld [vmem:[%s855_s3 + $0x10] sm:$0xff]  ;;  %v197_v14 = vld [vmem:[%s855_s3 + $0x18] sm:$0xff] }
   0x4   :  { %495 = vmatprep.subr.bf16.mxu0 %v494_v4  ;;  %526 = vmatprep.subr.bf16.mxu1 %v494_v4  ;;  %v37_v9 = vld [vmem:[%s853_s2 + $0x20] sm:$0xff]  ;;  %545 = vrsqrt.f32 %v196_v12  ;;  %v195_v15 = vld [vmem:[%s855_s3 + $0x8] sm:$0xff]  ;;  %v39_v17 = vld [vmem:[%s853_s2 + $0x30] sm:$0xff]  ;;  %vm212_vm0 = vcmp.gt.f32.partialorder %v196_v12, 0.0  ;;  %vm213_vm2 = vcmp.gt.f32.partialorder %v197_v14, 0.0 }
   0x5   :  { %497 = vmatpush3.bf16.xpose.msra.mxu0 %v494_v4  ;;  %534 = vmatpush3.bf16.xpose.msra.mxu1 %v494_v4  ;;  %v502_v11 = vpack.c.bf16 %v38_v10, %v37_v9  ;;  %v194_v13 = vld [vmem:[%s855_s3] sm:$0xff]  ;;  %v199_v16 = vld [vmem:[%s855_s3 + $0x28] sm:$0xff]  ;;  %v40_v18 = vld [vmem:[%s853_s2 + $0x38] sm:$0xff]  ;;  %vm211_vm3 = vcmp.gt.f32.partialorder %v195_v15, 0.0 }
   0x6   :  { %499 = vmatprep.subr.bf16.mxu0 %v498_v6  ;;  %527 = vmatprep.subr.bf16.mxu1 %v498_v6  ;;  %547 = vrsqrt.f32 %v194_v13  ;;  %v198_v19 = vld [vmem:[%s855_s3 + $0x20] sm:$0xff]  ;;  %v201_v20 = vld [vmem:[%s855_s3 + $0x38] sm:$0xff]  ;;  %v506_v21 = vpack.c.bf16 %v40_v18, %v39_v17  ;;  %v200_v22 = vld [vmem:[%s855_s3 + $0x30] sm:$0xff]  ;;  %vm210_vm1 = vcmp.gt.f32.partialorder %v194_v13, 0.0  ;;  %vm215_vm4 = vcmp.gt.f32.partialorder %v199_v16, 0.0 }
   0x7   :  { %482 = vmatprep.mubr.f32.mxu1 %v25_v8  ;;  %549 = vrsqrt.f32 %v197_v14  ;;  %v660_v23 = vld [vmem:[%s855_s3 + $0x48] sm:$0xff]  ;;  %v41_v26 = vld [vmem:[%s853_s2 + $0x40] sm:$0xff]  ;;  %v205_v34 = vld [vmem:[%s855_s3 + $0x58] sm:$0xff]  ;;  %vm214_vm5 = vcmp.gt.f32.partialorder %v198_v19, 0.0  ;;  %vm217_vm6 = vcmp.gt.f32.partialorder %v201_v20, 0.0  ;;  %vm216_vm7 = vcmp.gt.f32.partialorder %v200_v22, 0.0 }
   0x8   :  { %551 = vrsqrt.f32 %v195_v15  ;;  %v42_v27 = vld [vmem:[%s853_s2 + $0x48] sm:$0xff]  ;;  %v202_v31 = vld [vmem:[%s855_s3 + $0x40] sm:$0xff]  ;;  %v204_v38 = vld [vmem:[%s855_s3 + $0x50] sm:$0xff]  ;;  %vm219_vm8 = vcmp.gt.f32.partialorder %v660_v23, 0.0  ;;  %vm221_vm10 = vcmp.gt.f32.partialorder %v205_v34, 0.0 }
   0x9   :  { %553 = vrsqrt.f32 %v199_v16  ;;  %v510_v36 = vpack.c.bf16 %v42_v27, %v41_v26  ;;  %v207_v41 = vld [vmem:[%s855_s3 + $0x68] sm:$0xff]  ;;  %v43_v43 = vld [vmem:[%s853_s2 + $0x50] sm:$0xff]  ;;  %v44_v44 = vld [vmem:[%s853_s2 + $0x58] sm:$0xff]  ;;  %vm218_vm9 = vcmp.gt.f32.partialorder %v202_v31, 0.0  ;;  %vm220_vm11 = vcmp.gt.f32.partialorder %v204_v38, 0.0 }
   0xa   :  { %555 = vrsqrt.f32 %v198_v19  ;;  %v206_v46 = vld [vmem:[%s855_s3 + $0x60] sm:$0xff]  ;;  %v209_v49 = vld [vmem:[%s855_s3 + $0x78] sm:$0xff]  ;;  %v514_v51 = vpack.c.bf16 %v44_v44, %v43_v43  ;;  %v208_v53 = vld [vmem:[%s855_s3 + $0x70] sm:$0xff]  ;;  %vm223_vm12 = vcmp.gt.f32.partialorder %v207_v41, 0.0 }
   0xb   :  { %557 = vrsqrt.f32 %v201_v20  ;;  %v45_v57 = vld [vmem:[%s853_s2 + $0x60] sm:$0xff]  ;;  %v46_v58 = vld [vmem:[%s853_s2 + $0x68] sm:$0xff]  ;;  %vm222_vm13 = vcmp.gt.f32.partialorder %v206_v46, 0.0  ;;  %vm225_vm14 = vcmp.gt.f32.partialorder %v209_v49, 0.0  ;;  %v47_v4 = vld [vmem:[%s853_s2 + $0x70] sm:$0xff]  ;;  %vm224_vm15 = vcmp.gt.f32.partialorder %v208_v53, 0.0 }
   0xc   :  { %559 = vrsqrt.f32 %v200_v22  ;;  %v518_v63 = vpack.c.bf16 %v46_v58, %v45_v57  ;;  %v48_v5 = vld [vmem:[%s853_s2 + $0x78] sm:$0xff]  ;;  %v26_v12 = vld [vmem:[%s854_s1 + $0x48] sm:$0xff]  ;;  %v19_v13 = vld [vmem:[%s854_s1 + $0x10] sm:$0xff] }
   0xd   :  { %501 = vmatpush3.bf16.xpose.msra.mxu0 %v498_v6  ;;  %535 = vmatpush3.bf16.xpose.msra.mxu1 %v498_v6  ;;  %561 = vrsqrt.f32 %v660_v23  ;;  %v522_v9 = vpack.c.bf16 %v48_v5, %v47_v4  ;;  %v27_v14 = vld [vmem:[%s854_s1 + $0x50] sm:$0xff]  ;;  %v20_v15 = vld [vmem:[%s854_s1 + $0x18] sm:$0xff]  ;;  %v21_v17 = vld [vmem:[%s854_s1 + $0x20] sm:$0xff] }
   0xe   :  { %503 = vmatprep.subr.bf16.mxu0 %v502_v11  ;;  %528 = vmatprep.subr.bf16.mxu1 %v502_v11  ;;  %v546_v24 = vpop.eup %545  ;;  %563 = vrsqrt.f32 %v202_v31  ;;  %v28_v16 = vld [vmem:[%s854_s1 + $0x58] sm:$0xff]  ;;  %v29_v18 = vld [vmem:[%s854_s1 + $0x60] sm:$0xff]  ;;  %v22_v19 = vld [vmem:[%s854_s1 + $0x28] sm:$0xff] }
   0xf   :  { %v244_v28 = vsel %vm212_vm0, %v546_v24, 0.0  ;;  %565 = vrsqrt.f32 %v205_v34  ;;  %v30_v20 = vld [vmem:[%s854_s1 + $0x68] sm:$0xff]  ;;  %v31_v22 = vld [vmem:[%s854_s1 + $0x70] sm:$0xff]  ;;  %v24_v23 = vld [vmem:[%s854_s1 + $0x38] sm:$0xff] }
  0x10   :  { %v548_v25 = vpop.eup %547  ;;  %286 = vperm.xlu1 %544, %v244_v28   ;;  %567 = vrsqrt.f32 %v204_v38  ;;  %v32_v24 = vld [vmem:[%s854_s1 + $0x78] sm:$0xff]  ;;  %v259_v38 = vld [vmem:[%s856_s0 + $0x8] sm:$0xff]  ;;  %v258_v44 = vld [vmem:[%s856_s0] sm:$0xff] }
  0x11   :  { %v550_v29 = vpop.eup %549  ;;  %v242_v30 = vsel %vm210_vm1, %v548_v25, 0.0  ;;  %569 = vrsqrt.f32 %v207_v41  ;;  %v269_v58 = vld [vmem:[%s856_s0 + $0x58] sm:$0xff] }
  0x12   :  { %v552_v32 = vpop.eup %551  ;;  %276 = vperm.xlu0 %543, %v242_v30   ;;  %v245_v33 = vsel %vm213_vm2, %v550_v29, 0.0  ;;  %571 = vrsqrt.f32 %v206_v46  ;;  %v266_v46 = vld [vmem:[%s856_s0 + $0x40] sm:$0xff] }
  0x13   :  { %v554_v35 = vpop.eup %553  ;;  %v243_v37 = vsel %vm211_vm3, %v552_v32, 0.0  ;;  %573 = vrsqrt.f32 %v209_v49 }
  0x14   :  { %291 = vperm.xlu1 %544, %v245_v33   ;;  %v556_v39 = vpop.eup %555  ;;  %v247_v40 = vsel %vm215_vm4, %v554_v35, 0.0  ;;  %575 = vrsqrt.f32 %v208_v53 }
  0x15   :  { %505 = vmatpush3.bf16.xpose.msra.mxu0 %v502_v11  ;;  %536 = vmatpush3.bf16.xpose.msra.mxu1 %v502_v11  ;;  %v558_v42 = vpop.eup %557  ;;  %v246_v45 = vsel %vm214_vm5, %v556_v39, 0.0  ;;  %v18_v11 = vld [vmem:[%s854_s1 + $0x8] sm:$0xff] }
  0x16   :  { %507 = vmatprep.subr.bf16.mxu0 %v506_v21  ;;  %529 = vmatprep.subr.bf16.mxu1 %v506_v21  ;;  %v560_v47 = vpop.eup %559  ;;  %v249_v48 = vsel %vm217_vm6, %v558_v42, 0.0 }
  0x17   :  { %281 = vperm.xlu0 %543, %v243_v37   ;;  %v562_v50 = vpop.eup %561  ;;  %v248_v52 = vsel %vm216_vm7, %v560_v47, 0.0 }
  0x18   :  { %301 = vperm.xlu1 %544, %v247_v40   ;;  %v564_v54 = vpop.eup %563  ;;  %v251_v55 = vsel %vm219_vm8, %v562_v50, 0.0  ;;  %v267_v40 = vld [vmem:[%s856_s0 + $0x48] sm:$0xff] }
  0x19   :  { %v566_v56 = vpop.eup %565  ;;  %v250_v59 = vsel %vm218_vm9, %v564_v54, 0.0 }
  0x1a   :  { %v568_v60 = vpop.eup %567  ;;  %v253_v61 = vsel %vm221_vm10, %v566_v56, 0.0  ;;  %v261_v56 = vld [vmem:[%s856_s0 + $0x18] sm:$0xff] }
  0x1b   :  { %296 = vperm.xlu0 %543, %v246_v45   ;;  %v570_v62 = vpop.eup %569  ;;  %v252_v0 = vsel %vm220_vm11, %v568_v60, 0.0 }
  0x1c   :  { %311 = vperm.xlu1 %544, %v249_v48   ;;  %v572_v1 = vpop.eup %571  ;;  %v255_v2 = vsel %vm223_vm12, %v570_v62, 0.0  ;;  %v260_v62 = vld [vmem:[%s856_s0 + $0x10] sm:$0xff] }
  0x1d   :  { %509 = vmatpush3.bf16.xpose.msra.mxu0 %v506_v21  ;;  %537 = vmatpush3.bf16.xpose.msra.mxu1 %v506_v21  ;;  %v574_v3 = vpop.eup %573  ;;  %v254_v6 = vsel %vm222_vm13, %v572_v1, 0.0  ;;  %v23_v21 = vld [vmem:[%s854_s1 + $0x30] sm:$0xff] }
  0x1e   :  { %511 = vmatprep.subr.bf16.mxu0 %v510_v36  ;;  %530 = vmatprep.subr.bf16.mxu1 %v510_v36  ;;  %v576_v7 = vpop.eup %575  ;;  %v257_v8 = vsel %vm225_vm14, %v574_v3, 0.0 }
  0x1f   :  { %306 = vperm.xlu0 %543, %v248_v52   ;;  %v256_v10 = vsel %vm224_vm15, %v576_v7, 0.0 }
  0x20   :  { %321 = vperm.xlu1 %544, %v251_v55  }
  0x23   :  { %316 = vperm.xlu0 %543, %v250_v59  }
  0x24   :  { %331 = vperm.xlu1 %544, %v253_v61  }
  0x25   :  { %513 = vmatpush3.bf16.xpose.msra.mxu0 %v510_v36  ;;  %538 = vmatpush3.bf16.xpose.msra.mxu1 %v510_v36 }
  0x26   :  { %515 = vmatprep.subr.bf16.mxu0 %v514_v51  ;;  %531 = vmatprep.subr.bf16.mxu1 %v514_v51 }
  0x27   :  { %326 = vperm.xlu0 %543, %v252_v0   ;;  %v268_v0 = vld [vmem:[%s856_s0 + $0x50] sm:$0xff] }
  0x28   :  { %341 = vperm.xlu1 %544, %v255_v2  }
  0x2b   :  { %336 = vperm.xlu0 %543, %v254_v6  }
  0x2c   :  { %351 = vperm.xlu1 %544, %v257_v8   ;;  %v263_v8 = vld [vmem:[%s856_s0 + $0x28] sm:$0xff] }
  0x2d   :  { %517 = vmatpush3.bf16.xpose.msra.mxu0 %v514_v51  ;;  %539 = vmatpush3.bf16.xpose.msra.mxu1 %v514_v51 }
  0x2e   :  { %519 = vmatprep.subr.bf16.mxu0 %v518_v63  ;;  %532 = vmatprep.subr.bf16.mxu1 %v518_v63 }
  0x2f   :  { %346 = vperm.xlu0 %543, %v256_v10   ;;  %v271_v10 = vld [vmem:[%s856_s0 + $0x68] sm:$0xff] }
  0x35   :  { %521 = vmatpush3.bf16.xpose.msra.mxu0 %v518_v63  ;;  %540 = vmatpush3.bf16.xpose.msra.mxu1 %v518_v63 }
  0x36   :  { %523 = vmatprep.subr.bf16.mxu0 %v522_v9  ;;  %533 = vmatprep.subr.bf16.mxu1 %v522_v9 }
  0x3d   :  { %525 = vmatpush3.bf16.xpose.msra.mxu0 %v522_v9  ;;  %541 = vmatpush3.bf16.xpose.msra.mxu1 %v522_v9 }
  0x44   :  { %471 = vmatmul.mubr.f32.vlgmr.msra.gmra.mrb[0].mxu0 %v18_v11  ;;  %483 = vmatmul.mubr.f32.vlgmr.msra.gmra.mrb[0].mxu1 %v26_v12 }
  0x45   :  { %473 = vmatprep.mubr.f32.mxu0 %v19_v13  ;;  %485 = vmatprep.mubr.f32.mxu1 %v27_v14  ;;  %v262_v14 = vld [vmem:[%s856_s0 + $0x20] sm:$0xff] }
  0x48   :  { %474 = vmatmul.mubr.f32.gmra.mrb[2].mxu0 %v20_v15  ;;  %486 = vmatmul.mubr.f32.gmra.mrb[2].mxu1 %v28_v16  ;;  %v270_v16 = vld [vmem:[%s856_s0 + $0x60] sm:$0xff] }
  0x49   :  { %476 = vmatprep.mubr.f32.mxu0 %v21_v17  ;;  %488 = vmatprep.mubr.f32.mxu1 %v29_v18 }
  0x4c   :  { %477 = vmatmul.mubr.f32.gmra.mrb[4].mxu0 %v22_v19  ;;  %489 = vmatmul.mubr.f32.gmra.mrb[4].mxu1 %v30_v20 }
  0x4d   :  { %479 = vmatprep.mubr.f32.mxu0 %v23_v21  ;;  %491 = vmatprep.mubr.f32.mxu1 %v31_v22 }
  0x50   :  { %480 = vmatmul.mubr.f32.gmra.mrb[6].mxu0 %v24_v23  ;;  %492 = vmatmul.mubr.f32.gmra.mrb[6].mxu1 %v32_v24 }
  0x8f   :  { %v287_v25 = vpop.permute.xlu1 %286 }
  0x91   :  { %v277_v26 = vpop.permute.xlu0 %276 }
  0x93   :  { %v292_v27 = vpop.permute.xlu1 %291 }
  0x96   :  { %v282_v28 = vpop.permute.xlu0 %281 }
  0x97   :  { %v302_v29 = vpop.permute.xlu1 %301 }
  0x9a   :  { %v297_v30 = vpop.permute.xlu0 %296 }
  0x9b   :  { %v751_v31 = vpop.permute.xlu1 %311 }
  0x9e   :  { %v753_v32 = vpop.permute.xlu0 %306 }
  0x9f   :  { %v322_v33 = vpop.permute.xlu1 %321 }
  0xa2   :  { %v317_v34 = vpop.permute.xlu0 %316 }
  0xa3   :  { %v332_v35 = vpop.permute.xlu1 %331 }
  0xa6   :  { %v327_v36 = vpop.permute.xlu0 %326 }
  0xa7   :  { %v342_v49 = vpop.permute.xlu1 %341 }
  0xaa   :  { %v337_v50 = vpop.permute.xlu0 %336 }
  0xab   :  { %v352_v19 = vpop.permute.xlu1 %351 }
  0xae   :  { %v347_v20 = vpop.permute.xlu0 %346 }
 0x117   :  { %v472_v37 = vpop.f32.mrb[0].mxu0  ;;  %v484_v39 = vpop.f32.mrb[0].mxu1 }
 0x118   :  { %v355_v41 = vmul.f32 %v472_v37, %v282_v28  ;;  %v363_v42 = vmul.f32 %v484_v39, %v322_v33  ;;  %v115_v43 = vpop.f32.mrb[1].mxu0  ;;  %v155_v45 = vpop.f32.mrb[1].mxu1  ;;  %v273_v28 = vld [vmem:[%s856_s0 + $0x78] sm:$0xff] }
 0x119   :  { %v354_v47 = vmul.f32 %v277_v26, %v115_v43  ;;  %v362_v48 = vmul.f32 %v317_v34, %v155_v45  ;;  %v265_v26 = vld [vmem:[%s856_s0 + $0x38] sm:$0xff]  ;;  %v264_v34 = vld [vmem:[%s856_s0 + $0x30] sm:$0xff] }
 0x11a   :  { %v371_v51 = vadd.f32 %v355_v41, %v259_v38  ;;  %v379_v52 = vadd.f32 %v363_v42, %v267_v40 }
 0x11b   :  { %v370_v53 = vadd.f32 %v354_v47, %v258_v44  ;;  %v378_v54 = vadd.f32 %v362_v48, %v266_v46  ;;  %v475_v55 = vpop.f32.mrb[2].mxu0  ;;  %v487_v57 = vpop.f32.mrb[2].mxu1 }
 0x11c   :  { %387 = vst [vmem:[%s857_s4 + $0x8] sm:$0xff] %v371_v51  ;;  %395 = vst [vmem:[%s857_s4 + $0x48] sm:$0xff] %v379_v52  ;;  %v357_v59 = vmul.f32 %v475_v55, %v292_v27  ;;  %v365_v60 = vmul.f32 %v487_v57, %v332_v35  ;;  %v125_v61 = vpop.f32.mrb[3].mxu0  ;;  %v165_v63 = vpop.f32.mrb[3].mxu1 }
 0x11d   :  { %386 = vst [vmem:[%s857_s4] sm:$0xff] %v370_v53  ;;  %394 = vst [vmem:[%s857_s4 + $0x40] sm:$0xff] %v378_v54  ;;  %v356_v1 = vmul.f32 %v287_v25, %v125_v61  ;;  %v364_v2 = vmul.f32 %v327_v36, %v165_v63  ;;  %v272_v36 = vld [vmem:[%s856_s0 + $0x70] sm:$0xff] }
 0x11e   :  { %v373_v3 = vadd.f32 %v357_v59, %v261_v56  ;;  %v381_v4 = vadd.f32 %v365_v60, %v269_v58 }
 0x11f   :  { %v372_v5 = vadd.f32 %v356_v1, %v260_v62  ;;  %v380_v6 = vadd.f32 %v364_v2, %v268_v0  ;;  %v478_v7 = vpop.f32.mrb[4].mxu0  ;;  %v490_v9 = vpop.f32.mrb[4].mxu1 }
 0x120   :  { %389 = vst [vmem:[%s857_s4 + $0x18] sm:$0xff] %v373_v3  ;;  %397 = vst [vmem:[%s857_s4 + $0x58] sm:$0xff] %v381_v4  ;;  %v359_v11 = vmul.f32 %v478_v7, %v302_v29  ;;  %v367_v12 = vmul.f32 %v490_v9, %v342_v49  ;;  %v135_v13 = vpop.f32.mrb[5].mxu0  ;;  %v175_v15 = vpop.f32.mrb[5].mxu1 }
 0x121   :  { %388 = vst [vmem:[%s857_s4 + $0x10] sm:$0xff] %v372_v5  ;;  %396 = vst [vmem:[%s857_s4 + $0x50] sm:$0xff] %v380_v6  ;;  %v358_v17 = vmul.f32 %v297_v30, %v135_v13  ;;  %v366_v18 = vmul.f32 %v337_v50, %v175_v15 }
 0x122   :  { %v375_v21 = vadd.f32 %v359_v11, %v263_v8  ;;  %v383_v22 = vadd.f32 %v367_v12, %v271_v10 }
 0x123   :  { %v374_v23 = vadd.f32 %v358_v17, %v262_v14  ;;  %v382_v24 = vadd.f32 %v366_v18, %v270_v16  ;;  %v481_v25 = vpop.f32.mrb[6].mxu0  ;;  %v493_v27 = vpop.f32.mrb[6].mxu1 }
 0x124   :  { %391 = vst [vmem:[%s857_s4 + $0x28] sm:$0xff] %v375_v21  ;;  %399 = vst [vmem:[%s857_s4 + $0x68] sm:$0xff] %v383_v22  ;;  %v361_v29 = vmul.f32 %v481_v25, %v751_v31  ;;  %v369_v30 = vmul.f32 %v493_v27, %v352_v19  ;;  %v145_v33 = vpop.f32.mrb[7].mxu0  ;;  %v185_v35 = vpop.f32.mrb[7].mxu1 }
 0x125   :  { %390 = vst [vmem:[%s857_s4 + $0x20] sm:$0xff] %v374_v23  ;;  %398 = vst [vmem:[%s857_s4 + $0x60] sm:$0xff] %v382_v24  ;;  %v360_v31 = vmul.f32 %v753_v32, %v145_v33  ;;  %v368_v37 = vmul.f32 %v347_v20, %v185_v35 }
 0x126   :  { %v377_v38 = vadd.f32 %v361_v29, %v265_v26  ;;  %v385_v39 = vadd.f32 %v369_v30, %v273_v28 }
 0x127   :  { %v376_v40 = vadd.f32 %v360_v31, %v264_v34  ;;  %v384_v41 = vadd.f32 %v368_v37, %v272_v36 }
 0x128   :  { %393 = vst [vmem:[%s857_s4 + $0x38] sm:$0xff] %v377_v38  ;;  %401 = vst [vmem:[%s857_s4 + $0x78] sm:$0xff] %v385_v39 }
 0x129   :  { %392 = vst [vmem:[%s857_s4 + $0x30] sm:$0xff] %v376_v40  ;;  %400 = vst [vmem:[%s857_s4 + $0x70] sm:$0xff] %v384_v41 }

// kernel: global_gnn_forward.8
= control target key start
LH: loop header
LB: loop body
LE: loop exit
PB: predicated region body
PF: predicated region fallthrough
CT: control target
= control target key end

     0   :  { %v592_v3 = vmov 0.0   ;;  %s969_s1 = inlined_call_operand.vmem [shape: f32[128,384], index: 1, kind: input, shape index: {}]   ;;  %s970_s0 = inlined_call_operand.vmem [shape: f32[128,128], index: 0, kind: input, shape index: {}]   ;;  %s971_s2 = inlined_call_operand.vmem [shape: f32[128,128], index: 2, kind: output, shape index: {0}]   ;;  %s972_s3 = inlined_call_operand.vmem [shape: f32[128,256], index: 3, kind: output, shape index: {1}]  }
   0x1   :  { %v30_v0 = vld [vmem:[%s969_s1 + $0x8] sm:$0xff]  ;;  %v33_v1 = vld [vmem:[%s969_s1 + $0x20] sm:$0xff]  ;;  %141 = vmatprep.mubr.f32.mxu0 %v592_v3  ;;  %v32_v5 = vld [vmem:[%s969_s1 + $0x18] sm:$0xff] }
   0x2   :  { %v29_v2 = vld [vmem:[%s969_s1] sm:$0xff]  ;;  %v527_v4 = vpack.c.bf16 %v33_v1, %v30_v0  ;;  %v36_v6 = vld [vmem:[%s969_s1 + $0x38] sm:$0xff]  ;;  %v39_v7 = vld [vmem:[%s969_s1 + $0x50] sm:$0xff] }
   0x3   :  { %v529_v8 = vpack.c.bf16 %v32_v5, %v29_v2  ;;  %v531_v9 = vpack.c.bf16 %v39_v7, %v36_v6  ;;  %v35_v10 = vld [vmem:[%s969_s1 + $0x30] sm:$0xff]  ;;  %v38_v11 = vld [vmem:[%s969_s1 + $0x48] sm:$0xff]  ;;  %v45_v13 = vld [vmem:[%s969_s1 + $0x80] sm:$0xff] }
   0x4   :  { %v42_v12 = vld [vmem:[%s969_s1 + $0x68] sm:$0xff]  ;;  %528 = vmatprep.subr.bf16.mxu0 %v527_v4  ;;  %v533_v14 = vpack.c.bf16 %v38_v11, %v35_v10  ;;  %v41_v16 = vld [vmem:[%s969_s1 + $0x60] sm:$0xff]  ;;  %v44_v17 = vld [vmem:[%s969_s1 + $0x78] sm:$0xff] }
   0x5   :  { %530 = vmatpush1.bf16.msra.mxu0 %v529_v8  ;;  %v535_v15 = vpack.c.bf16 %v45_v13, %v42_v12  ;;  %v48_v18 = vld [vmem:[%s969_s1 + $0x98] sm:$0xff]  ;;  %v51_v19 = vld [vmem:[%s969_s1 + $0xb0] sm:$0xff]  ;;  %v537_v20 = vpack.c.bf16 %v44_v17, %v41_v16  ;;  %v50_v23 = vld [vmem:[%s969_s1 + $0xa8] sm:$0xff] }
   0x6   :  { %532 = vmatprep.subr.bf16.mxu0 %v531_v9  ;;  %v539_v21 = vpack.c.bf16 %v51_v19, %v48_v18  ;;  %v47_v22 = vld [vmem:[%s969_s1 + $0x90] sm:$0xff]  ;;  %v54_v24 = vld [vmem:[%s969_s1 + $0xc8] sm:$0xff]  ;;  %v57_v25 = vld [vmem:[%s969_s1 + $0xe0] sm:$0xff] }
   0x7   :  { %v31_v26 = vld [vmem:[%s969_s1 + $0x10] sm:$0xff]  ;;  %v34_v27 = vld [vmem:[%s969_s1 + $0x28] sm:$0xff]  ;;  %v677_v28 = vld [vmem:[%s970_s0] sm:$0xff]  ;;  %v541_v30 = vpack.c.bf16 %v50_v23, %v47_v22  ;;  %v543_v34 = vpack.c.bf16 %v57_v25, %v54_v24 }
   0x8   :  { %v37_v29 = vld [vmem:[%s969_s1 + $0x40] sm:$0xff]  ;;  %v559_v32 = vpack.c.bf16 %v34_v27, %v31_v26  ;;  %v40_v33 = vld [vmem:[%s969_s1 + $0x58] sm:$0xff]  ;;  %503 = vmatprep.mubr.f32.mxu1 %v677_v28  ;;  %v43_v37 = vld [vmem:[%s969_s1 + $0x70] sm:$0xff] }
   0x9   :  { %534 = vmatpush1.bf16.msra.mxu0 %v533_v14  ;;  %v53_v31 = vld [vmem:[%s969_s1 + $0xc0] sm:$0xff]  ;;  %v56_v35 = vld [vmem:[%s969_s1 + $0xd8] sm:$0xff]  ;;  %v563_v36 = vpack.c.bf16 %v40_v33, %v37_v29  ;;  %v46_v38 = vld [vmem:[%s969_s1 + $0x88] sm:$0xff] }
   0xa   :  { %536 = vmatprep.subr.bf16.mxu0 %v535_v15  ;;  %v60_v39 = vld [vmem:[%s969_s1 + $0xf8] sm:$0xff]  ;;  %v63_v40 = vld [vmem:[%s969_s1 + $0x110] sm:$0xff]  ;;  %560 = vmatprep.subr.bf16.mxu1 %v559_v32  ;;  %v545_v41 = vpack.c.bf16 %v56_v35, %v53_v31  ;;  %v567_v43 = vpack.c.bf16 %v46_v38, %v43_v37  ;;  %v62_v45 = vld [vmem:[%s969_s1 + $0x108] sm:$0xff] }
   0xb   :  { %562 = vmatpush3.bf16.msra.mxu1 %v559_v32  ;;  %v59_v42 = vld [vmem:[%s969_s1 + $0xf0] sm:$0xff]  ;;  %v547_v44 = vpack.c.bf16 %v63_v40, %v60_v39  ;;  %v49_v46 = vld [vmem:[%s969_s1 + $0xa0] sm:$0xff]  ;;  %v52_v47 = vld [vmem:[%s969_s1 + $0xb8] sm:$0xff] }
   0xc   :  { %564 = vmatprep.subr.bf16.mxu1 %v563_v36  ;;  %v66_v48 = vld [vmem:[%s969_s1 + $0x128] sm:$0xff]  ;;  %v69_v49 = vld [vmem:[%s969_s1 + $0x140] sm:$0xff]  ;;  %v549_v50 = vpack.c.bf16 %v62_v45, %v59_v42  ;;  %v571_v52 = vpack.c.bf16 %v52_v47, %v49_v46  ;;  %v68_v54 = vld [vmem:[%s969_s1 + $0x138] sm:$0xff] }
   0xd   :  { %538 = vmatpush1.bf16.msra.mxu0 %v537_v20  ;;  %v65_v51 = vld [vmem:[%s969_s1 + $0x120] sm:$0xff]  ;;  %v551_v53 = vpack.c.bf16 %v69_v49, %v66_v48  ;;  %v55_v55 = vld [vmem:[%s969_s1 + $0xd0] sm:$0xff]  ;;  %v58_v56 = vld [vmem:[%s969_s1 + $0xe8] sm:$0xff] }
   0xe   :  { %540 = vmatprep.subr.bf16.mxu0 %v539_v21  ;;  %v72_v57 = vld [vmem:[%s969_s1 + $0x158] sm:$0xff]  ;;  %v75_v58 = vld [vmem:[%s969_s1 + $0x170] sm:$0xff]  ;;  %v553_v59 = vpack.c.bf16 %v68_v54, %v65_v51  ;;  %v575_v61 = vpack.c.bf16 %v58_v56, %v55_v55  ;;  %v74_v63 = vld [vmem:[%s969_s1 + $0x168] sm:$0xff] }
   0xf   :  { %566 = vmatpush3.bf16.msra.mxu1 %v563_v36  ;;  %v71_v60 = vld [vmem:[%s969_s1 + $0x150] sm:$0xff]  ;;  %v555_v62 = vpack.c.bf16 %v75_v58, %v72_v57  ;;  %v61_v0 = vld [vmem:[%s969_s1 + $0x100] sm:$0xff]  ;;  %v64_v1 = vld [vmem:[%s969_s1 + $0x118] sm:$0xff] }
  0x10   :  { %568 = vmatprep.subr.bf16.mxu1 %v567_v43  ;;  %v557_v2 = vpack.c.bf16 %v74_v63, %v71_v60  ;;  %v579_v4 = vpack.c.bf16 %v64_v1, %v61_v0  ;;  %v67_v5 = vld [vmem:[%s969_s1 + $0x130] sm:$0xff]  ;;  %v70_v6 = vld [vmem:[%s969_s1 + $0x148] sm:$0xff]  ;;  %v73_v8 = vld [vmem:[%s969_s1 + $0x160] sm:$0xff] }
  0x11   :  { %542 = vmatpush1.bf16.msra.mxu0 %v541_v30  ;;  %v583_v7 = vpack.c.bf16 %v70_v6, %v67_v5  ;;  %v76_v9 = vld [vmem:[%s969_s1 + $0x178] sm:$0xff]  ;;  %v14_v10 = vld [vmem:[%s970_s0 + $0x8] sm:$0xff]  ;;  %v15_v12 = vld [vmem:[%s970_s0 + $0x10] sm:$0xff] }
  0x12   :  { %544 = vmatprep.subr.bf16.mxu0 %v543_v34  ;;  %v587_v11 = vpack.c.bf16 %v76_v9, %v73_v8  ;;  %v16_v13 = vld [vmem:[%s970_s0 + $0x18] sm:$0xff]  ;;  %v17_v14 = vld [vmem:[%s970_s0 + $0x20] sm:$0xff]  ;;  %v18_v15 = vld [vmem:[%s970_s0 + $0x28] sm:$0xff] }
  0x13   :  { %570 = vmatpush3.bf16.msra.mxu1 %v567_v43  ;;  %v19_v16 = vld [vmem:[%s970_s0 + $0x30] sm:$0xff]  ;;  %v20_v17 = vld [vmem:[%s970_s0 + $0x38] sm:$0xff]  ;;  %v21_v18 = vld [vmem:[%s970_s0 + $0x40] sm:$0xff] }
  0x14   :  { %572 = vmatprep.subr.bf16.mxu1 %v571_v52  ;;  %v22_v19 = vld [vmem:[%s970_s0 + $0x48] sm:$0xff]  ;;  %v23_v20 = vld [vmem:[%s970_s0 + $0x50] sm:$0xff]  ;;  %v24_v21 = vld [vmem:[%s970_s0 + $0x58] sm:$0xff] }
  0x15   :  { %546 = vmatpush1.bf16.msra.mxu0 %v545_v41  ;;  %v25_v22 = vld [vmem:[%s970_s0 + $0x60] sm:$0xff]  ;;  %v26_v23 = vld [vmem:[%s970_s0 + $0x68] sm:$0xff]  ;;  %v27_v24 = vld [vmem:[%s970_s0 + $0x70] sm:$0xff] }
  0x16   :  { %548 = vmatprep.subr.bf16.mxu0 %v547_v44  ;;  %v28_v25 = vld [vmem:[%s970_s0 + $0x78] sm:$0xff] }
  0x17   :  { %574 = vmatpush3.bf16.msra.mxu1 %v571_v52 }
  0x18   :  { %576 = vmatprep.subr.bf16.mxu1 %v575_v61 }
  0x19   :  { %550 = vmatpush1.bf16.msra.mxu0 %v549_v50 }
  0x1a   :  { %552 = vmatprep.subr.bf16.mxu0 %v551_v53 }
  0x1b   :  { %578 = vmatpush3.bf16.msra.mxu1 %v575_v61 }
  0x1c   :  { %580 = vmatprep.subr.bf16.mxu1 %v579_v4 }
  0x1d   :  { %554 = vmatpush1.bf16.msra.mxu0 %v553_v59 }
  0x1e   :  { %556 = vmatprep.subr.bf16.mxu0 %v555_v62 }
  0x1f   :  { %582 = vmatpush3.bf16.msra.mxu1 %v579_v4 }
  0x20   :  { %584 = vmatprep.subr.bf16.mxu1 %v583_v7 }
  0x21   :  { %558 = vmatpush1.bf16.msra.mxu0 %v557_v2 }
  0x23   :  { %586 = vmatpush3.bf16.msra.mxu1 %v583_v7 }
  0x24   :  { %142 = vmatmul.mubr.f32.vlgmr.msra.gmra.mrb[0].mxu0 %v677_v28  ;;  %588 = vmatprep.subr.bf16.mxu1 %v587_v11 }
  0x25   :  { %147 = vmatprep.mubr.f32.mxu0 %v592_v3 }
  0x27   :  { %590 = vmatpush3.bf16.msra.mxu1 %v587_v11 }
  0x28   :  { %148 = vmatmul.mubr.f32.gmra.mrb[2].mxu0 %v14_v10 }
  0x29   :  { %153 = vmatprep.mubr.f32.mxu0 %v592_v3 }
  0x2a   :  { %504 = vmatmul.mubr.f32.vlgmr.msra.gmra.mrb[0].mxu1 %v14_v10 }
  0x2b   :  { %506 = vmatprep.mubr.f32.mxu1 %v15_v12 }
  0x2c   :  { %154 = vmatmul.mubr.f32.gmra.mrb[4].mxu0 %v15_v12 }
  0x2d   :  { %159 = vmatprep.mubr.f32.mxu0 %v592_v3 }
  0x2e   :  { %507 = vmatmul.mubr.f32.gmra.mrb[2].mxu1 %v16_v13 }
  0x2f   :  { %509 = vmatprep.mubr.f32.mxu1 %v17_v14 }
  0x30   :  { %160 = vmatmul.mubr.f32.gmra.mrb[6].mxu0 %v16_v13 }
  0x31   :  { %165 = vmatprep.mubr.f32.mxu0 %v592_v3 }
  0x32   :  { %510 = vmatmul.mubr.f32.gmra.mrb[4].mxu1 %v18_v15 }
  0x33   :  { %512 = vmatprep.mubr.f32.mxu1 %v19_v16 }
  0x34   :  { %166 = vmatmul.mubr.f32.gmra.mrb[8].mxu0 %v17_v14 }
  0x35   :  { %171 = vmatprep.mubr.f32.mxu0 %v592_v3 }
  0x36   :  { %513 = vmatmul.mubr.f32.gmra.mrb[6].mxu1 %v20_v17 }
  0x37   :  { %515 = vmatprep.mubr.f32.mxu1 %v21_v18 }
  0x38   :  { %172 = vmatmul.mubr.f32.gmra.mrb[10].mxu0 %v18_v15 }
  0x39   :  { %177 = vmatprep.mubr.f32.mxu0 %v592_v3 }
  0x3a   :  { %516 = vmatmul.mubr.f32.gmra.mrb[8].mxu1 %v22_v19 }
  0x3b   :  { %518 = vmatprep.mubr.f32.mxu1 %v23_v20 }
  0x3c   :  { %178 = vmatmul.mubr.f32.gmra.mrb[12].mxu0 %v19_v16 }
  0x3d   :  { %183 = vmatprep.mubr.f32.mxu0 %v592_v3 }
  0x3e   :  { %519 = vmatmul.mubr.f32.gmra.mrb[10].mxu1 %v24_v21 }
  0x3f   :  { %521 = vmatprep.mubr.f32.mxu1 %v25_v22 }
  0x40   :  { %184 = vmatmul.mubr.f32.gmra.mrb[14].mxu0 %v20_v17 }
  0x41   :  { %189 = vmatprep.mubr.f32.mxu0 %v592_v3 }
  0x42   :  { %522 = vmatmul.mubr.f32.gmra.mrb[12].mxu1 %v26_v23 }
  0x43   :  { %524 = vmatprep.mubr.f32.mxu1 %v27_v24 }
  0x44   :  { %190 = vmatmul.mubr.f32.gmra.mrb[16].mxu0 %v21_v18 }
  0x45   :  { %195 = vmatprep.mubr.f32.mxu0 %v592_v3 }
  0x46   :  { %525 = vmatmul.mubr.f32.gmra.mrb[14].mxu1 %v28_v25 }
  0x48   :  { %196 = vmatmul.mubr.f32.gmra.mrb[18].mxu0 %v22_v19 }
  0x49   :  { %201 = vmatprep.mubr.f32.mxu0 %v592_v3 }
  0x4c   :  { %202 = vmatmul.mubr.f32.gmra.mrb[20].mxu0 %v23_v20 }
  0x4d   :  { %207 = vmatprep.mubr.f32.mxu0 %v592_v3 }
  0x50   :  { %208 = vmatmul.mubr.f32.gmra.mrb[22].mxu0 %v24_v21 }
  0x51   :  { %213 = vmatprep.mubr.f32.mxu0 %v592_v3 }
  0x54   :  { %214 = vmatmul.mubr.f32.gmra.mrb[24].mxu0 %v25_v22 }
  0x55   :  { %219 = vmatprep.mubr.f32.mxu0 %v592_v3 }
  0x58   :  { %220 = vmatmul.mubr.f32.gmra.mrb[26].mxu0 %v26_v23 }
  0x59   :  { %225 = vmatprep.mubr.f32.mxu0 %v592_v3 }
  0x5c   :  { %226 = vmatmul.mubr.f32.gmra.mrb[28].mxu0 %v27_v24 }
  0x5d   :  { %231 = vmatprep.mubr.f32.mxu0 %v592_v3 }
  0x60   :  { %232 = vmatmul.mubr.f32.gmra.mrb[30].mxu0 %v28_v25 }
  0xf7   :  { %v143_v26 = vpop.f32.mrb[0].mxu0 }
  0xf8   :  { %383 = vst [vmem:[%s971_s2] sm:$0xff] %v143_v26  ;;  %v145_v27 = vpop.f32.mrb[1].mxu0 }
  0xf9   :  { %399 = vst [vmem:[%s972_s3] sm:$0xff] %v145_v27 }
  0xfb   :  { %v149_v28 = vpop.f32.mrb[2].mxu0 }
  0xfc   :  { %384 = vst [vmem:[%s971_s2 + $0x8] sm:$0xff] %v149_v28  ;;  %v151_v29 = vpop.f32.mrb[3].mxu0 }
  0xfd   :  { %401 = vst [vmem:[%s972_s3 + $0x10] sm:$0xff] %v151_v29  ;;  %v505_v31 = vpop.f32.mrb[0].mxu1 }
  0xfe   :  { %402 = vst [vmem:[%s972_s3 + $0x18] sm:$0xff] %v505_v31  ;;  %v304_v33 = vpop.f32.mrb[1].mxu1 }
  0xff   :  { %v155_v3 = vpop.f32.mrb[4].mxu0  ;;  %400 = vst [vmem:[%s972_s3 + $0x8] sm:$0xff] %v304_v33 }
 0x100   :  { %385 = vst [vmem:[%s971_s2 + $0x10] sm:$0xff] %v155_v3  ;;  %v157_v30 = vpop.f32.mrb[5].mxu0 }
 0x101   :  { %403 = vst [vmem:[%s972_s3 + $0x20] sm:$0xff] %v157_v30  ;;  %v508_v35 = vpop.f32.mrb[2].mxu1 }
 0x102   :  { %406 = vst [vmem:[%s972_s3 + $0x38] sm:$0xff] %v508_v35  ;;  %v314_v37 = vpop.f32.mrb[3].mxu1 }
 0x103   :  { %v161_v32 = vpop.f32.mrb[6].mxu0  ;;  %404 = vst [vmem:[%s972_s3 + $0x28] sm:$0xff] %v314_v37 }
 0x104   :  { %386 = vst [vmem:[%s971_s2 + $0x18] sm:$0xff] %v161_v32  ;;  %v163_v34 = vpop.f32.mrb[7].mxu0 }
 0x105   :  { %405 = vst [vmem:[%s972_s3 + $0x30] sm:$0xff] %v163_v34  ;;  %v511_v39 = vpop.f32.mrb[4].mxu1 }
 0x106   :  { %410 = vst [vmem:[%s972_s3 + $0x58] sm:$0xff] %v511_v39  ;;  %v324_v41 = vpop.f32.mrb[5].mxu1 }
 0x107   :  { %v167_v36 = vpop.f32.mrb[8].mxu0  ;;  %408 = vst [vmem:[%s972_s3 + $0x48] sm:$0xff] %v324_v41 }
 0x108   :  { %387 = vst [vmem:[%s971_s2 + $0x20] sm:$0xff] %v167_v36  ;;  %v169_v38 = vpop.f32.mrb[9].mxu0 }
 0x109   :  { %407 = vst [vmem:[%s972_s3 + $0x40] sm:$0xff] %v169_v38  ;;  %v514_v43 = vpop.f32.mrb[6].mxu1 }
 0x10a   :  { %414 = vst [vmem:[%s972_s3 + $0x78] sm:$0xff] %v514_v43  ;;  %v334_v45 = vpop.f32.mrb[7].mxu1 }
 0x10b   :  { %v173_v40 = vpop.f32.mrb[10].mxu0  ;;  %412 = vst [vmem:[%s972_s3 + $0x68] sm:$0xff] %v334_v45 }
 0x10c   :  { %388 = vst [vmem:[%s971_s2 + $0x28] sm:$0xff] %v173_v40  ;;  %v175_v42 = vpop.f32.mrb[11].mxu0 }
 0x10d   :  { %409 = vst [vmem:[%s972_s3 + $0x50] sm:$0xff] %v175_v42  ;;  %v517_v47 = vpop.f32.mrb[8].mxu1 }
 0x10e   :  { %418 = vst [vmem:[%s972_s3 + $0x98] sm:$0xff] %v517_v47  ;;  %v344_v49 = vpop.f32.mrb[9].mxu1 }
 0x10f   :  { %v179_v44 = vpop.f32.mrb[12].mxu0  ;;  %416 = vst [vmem:[%s972_s3 + $0x88] sm:$0xff] %v344_v49 }
 0x110   :  { %389 = vst [vmem:[%s971_s2 + $0x30] sm:$0xff] %v179_v44  ;;  %v181_v46 = vpop.f32.mrb[13].mxu0 }
 0x111   :  { %411 = vst [vmem:[%s972_s3 + $0x60] sm:$0xff] %v181_v46  ;;  %v520_v51 = vpop.f32.mrb[10].mxu1 }
 0x112   :  { %422 = vst [vmem:[%s972_s3 + $0xb8] sm:$0xff] %v520_v51  ;;  %v354_v53 = vpop.f32.mrb[11].mxu1 }
 0x113   :  { %v185_v48 = vpop.f32.mrb[14].mxu0  ;;  %420 = vst [vmem:[%s972_s3 + $0xa8] sm:$0xff] %v354_v53 }
 0x114   :  { %390 = vst [vmem:[%s971_s2 + $0x38] sm:$0xff] %v185_v48  ;;  %v187_v50 = vpop.f32.mrb[15].mxu0 }
 0x115   :  { %413 = vst [vmem:[%s972_s3 + $0x70] sm:$0xff] %v187_v50  ;;  %v523_v55 = vpop.f32.mrb[12].mxu1 }
 0x116   :  { %426 = vst [vmem:[%s972_s3 + $0xd8] sm:$0xff] %v523_v55  ;;  %v364_v57 = vpop.f32.mrb[13].mxu1 }
 0x117   :  { %v191_v52 = vpop.f32.mrb[16].mxu0  ;;  %424 = vst [vmem:[%s972_s3 + $0xc8] sm:$0xff] %v364_v57 }
 0x118   :  { %391 = vst [vmem:[%s971_s2 + $0x40] sm:$0xff] %v191_v52  ;;  %v193_v54 = vpop.f32.mrb[17].mxu0 }
 0x119   :  { %415 = vst [vmem:[%s972_s3 + $0x80] sm:$0xff] %v193_v54  ;;  %v526_v59 = vpop.f32.mrb[14].mxu1 }
 0x11a   :  { %430 = vst [vmem:[%s972_s3 + $0xf8] sm:$0xff] %v526_v59  ;;  %v374_v61 = vpop.f32.mrb[15].mxu1 }
 0x11b   :  { %v197_v56 = vpop.f32.mrb[18].mxu0  ;;  %428 = vst [vmem:[%s972_s3 + $0xe8] sm:$0xff] %v374_v61 }
 0x11c   :  { %392 = vst [vmem:[%s971_s2 + $0x48] sm:$0xff] %v197_v56  ;;  %v199_v58 = vpop.f32.mrb[19].mxu0 }
 0x11d   :  { %417 = vst [vmem:[%s972_s3 + $0x90] sm:$0xff] %v199_v58 }
 0x11f   :  { %v203_v60 = vpop.f32.mrb[20].mxu0 }
 0x120   :  { %393 = vst [vmem:[%s971_s2 + $0x50] sm:$0xff] %v203_v60  ;;  %v205_v62 = vpop.f32.mrb[21].mxu0 }
 0x121   :  { %419 = vst [vmem:[%s972_s3 + $0xa0] sm:$0xff] %v205_v62 }
 0x123   :  { %v209_v63 = vpop.f32.mrb[22].mxu0 }
 0x124   :  { %394 = vst [vmem:[%s971_s2 + $0x58] sm:$0xff] %v209_v63  ;;  %v211_v0 = vpop.f32.mrb[23].mxu0 }
 0x125   :  { %421 = vst [vmem:[%s972_s3 + $0xb0] sm:$0xff] %v211_v0 }
 0x127   :  { %v215_v1 = vpop.f32.mrb[24].mxu0 }
 0x128   :  { %395 = vst [vmem:[%s971_s2 + $0x60] sm:$0xff] %v215_v1  ;;  %v217_v2 = vpop.f32.mrb[25].mxu0 }
 0x129   :  { %423 = vst [vmem:[%s972_s3 + $0xc0] sm:$0xff] %v217_v2 }
 0x12b   :  { %v221_v4 = vpop.f32.mrb[26].mxu0 }
 0x12c   :  { %396 = vst [vmem:[%s971_s2 + $0x68] sm:$0xff] %v221_v4  ;;  %v223_v5 = vpop.f32.mrb[27].mxu0 }
 0x12d   :  { %425 = vst [vmem:[%s972_s3 + $0xd0] sm:$0xff] %v223_v5 }
 0x12f   :  { %v227_v6 = vpop.f32.mrb[28].mxu0 }
 0x130   :  { %397 = vst [vmem:[%s971_s2 + $0x70] sm:$0xff] %v227_v6  ;;  %v229_v7 = vpop.f32.mrb[29].mxu0 }
 0x131   :  { %427 = vst [vmem:[%s972_s3 + $0xe0] sm:$0xff] %v229_v7 }
 0x133   :  { %v233_v8 = vpop.f32.mrb[30].mxu0 }
 0x134   :  { %398 = vst [vmem:[%s971_s2 + $0x78] sm:$0xff] %v233_v8  ;;  %v235_v9 = vpop.f32.mrb[31].mxu0 }
 0x135   :  { %429 = vst [vmem:[%s972_s3 + $0xf0] sm:$0xff] %v235_v9 }

// kernel: global_gnn_forward.6
= control target key start
LH: loop header
LB: loop body
LE: loop exit
PB: predicated region body
PF: predicated region fallthrough
CT: control target
= control target key end

     0   :  { %vm15_vm0 = vcmask 7168   ;;  %v482_v40 = vmov 0.0   ;;  %s690_s1 = inlined_call_operand.vmem [shape: f32[128,128], index: 1, kind: input, shape index: {}, may-alias: {0,1}]   ;;  %s691_s0 = inlined_call_operand.vmem [shape: f32[128,128], index: 0, kind: input, shape index: {}, may-alias: {0,1}]   ;;  %s692_s2 = inlined_call_operand.vmem [shape: f32[128,1], index: 2, kind: output, shape index: {}]  }
   0x1   :  { %v48_v0 = vld [vmem:[%s690_s1] sm:$0xff]  ;;  %v49_v1 = vld [vmem:[%s690_s1 + $0x8] sm:$0xff]  ;;  %v50_v2 = vld [vmem:[%s690_s1 + $0x10] sm:$0xff]  ;;  %25 = vst.msk [vmem:[#allocation2 + $0x48] sm:$0xff] %vm15_vm0, %v482_v40 }
   0x2   :  { %v433_v3 = vpack.c.bf16 %v49_v1, %v48_v0  ;;  %v51_v4 = vld [vmem:[%s690_s1 + $0x18] sm:$0xff]  ;;  %v32_v6 = vld [vmem:[%s691_s0] sm:$0xff]  ;;  %v53_v9 = vld [vmem:[%s690_s1 + $0x28] sm:$0xff]  ;;  %16 = vst.msk [vmem:[#allocation2] sm:$0xff] %vm15_vm0, %v482_v40 }
   0x3   :  { %v437_v5 = vpack.c.bf16 %v51_v4, %v50_v2  ;;  %v40_v7 = vld [vmem:[%s691_s0 + $0x40] sm:$0xff]  ;;  %409 = vmatprep.mubr.f32.mxu0 %v32_v6  ;;  %v54_v11 = vld [vmem:[%s690_s1 + $0x30] sm:$0xff]  ;;  %v55_v12 = vld [vmem:[%s690_s1 + $0x38] sm:$0xff]  ;;  %17 = vst.msk [vmem:[#allocation2 + $0x8] sm:$0xff] %vm15_vm0, %v482_v40 }
   0x4   :  { %434 = vmatprep.subr.bf16.mxu0 %v433_v3  ;;  %465 = vmatprep.subr.bf16.mxu1 %v433_v3  ;;  %v52_v8 = vld [vmem:[%s690_s1 + $0x20] sm:$0xff]  ;;  %v445_v13 = vpack.c.bf16 %v55_v12, %v54_v11  ;;  %v57_v15 = vld [vmem:[%s690_s1 + $0x48] sm:$0xff]  ;;  %v58_v17 = vld [vmem:[%s690_s1 + $0x50] sm:$0xff]  ;;  %18 = vst.msk [vmem:[#allocation2 + $0x10] sm:$0xff] %vm15_vm0, %v482_v40 }
   0x5   :  { %436 = vmatpush3.bf16.xpose.msra.mxu0 %v433_v3  ;;  %473 = vmatpush3.bf16.xpose.msra.mxu1 %v433_v3  ;;  %v441_v10 = vpack.c.bf16 %v53_v9, %v52_v8  ;;  %v56_v14 = vld [vmem:[%s690_s1 + $0x40] sm:$0xff]  ;;  %v59_v18 = vld [vmem:[%s690_s1 + $0x58] sm:$0xff]  ;;  %v61_v21 = vld [vmem:[%s690_s1 + $0x68] sm:$0xff]  ;;  %19 = vst.msk [vmem:[#allocation2 + $0x18] sm:$0xff] %vm15_vm0, %v482_v40 }
   0x6   :  { %438 = vmatprep.subr.bf16.mxu0 %v437_v5  ;;  %466 = vmatprep.subr.bf16.mxu1 %v437_v5  ;;  %v449_v16 = vpack.c.bf16 %v57_v15, %v56_v14  ;;  %v453_v19 = vpack.c.bf16 %v59_v18, %v58_v17  ;;  %v60_v20 = vld [vmem:[%s690_s1 + $0x60] sm:$0xff]  ;;  %v62_v23 = vld [vmem:[%s690_s1 + $0x70] sm:$0xff]  ;;  %v63_v24 = vld [vmem:[%s690_s1 + $0x78] sm:$0xff]  ;;  %20 = vst.msk [vmem:[#allocation2 + $0x20] sm:$0xff] %vm15_vm0, %v482_v40 }
   0x7   :  { %421 = vmatprep.mubr.f32.mxu1 %v40_v7  ;;  %v457_v22 = vpack.c.bf16 %v61_v21, %v60_v20  ;;  %v461_v25 = vpack.c.bf16 %v63_v24, %v62_v23  ;;  %v33_v26 = vld [vmem:[%s691_s0 + $0x8] sm:$0xff]  ;;  %v34_v28 = vld [vmem:[%s691_s0 + $0x10] sm:$0xff]  ;;  %v35_v30 = vld [vmem:[%s691_s0 + $0x18] sm:$0xff]  ;;  %21 = vst.msk [vmem:[#allocation2 + $0x28] sm:$0xff] %vm15_vm0, %v482_v40 }
   0x8   :  { %v41_v27 = vld [vmem:[%s691_s0 + $0x48] sm:$0xff]  ;;  %v42_v29 = vld [vmem:[%s691_s0 + $0x50] sm:$0xff]  ;;  %v43_v31 = vld [vmem:[%s691_s0 + $0x58] sm:$0xff]  ;;  %22 = vst.msk [vmem:[#allocation2 + $0x30] sm:$0xff] %vm15_vm0, %v482_v40 }
   0x9   :  { %v36_v32 = vld [vmem:[%s691_s0 + $0x20] sm:$0xff]  ;;  %v37_v34 = vld [vmem:[%s691_s0 + $0x28] sm:$0xff]  ;;  %v38_v36 = vld [vmem:[%s691_s0 + $0x30] sm:$0xff]  ;;  %23 = vst.msk [vmem:[#allocation2 + $0x38] sm:$0xff] %vm15_vm0, %v482_v40 }
   0xa   :  { %v44_v33 = vld [vmem:[%s691_s0 + $0x60] sm:$0xff]  ;;  %v45_v35 = vld [vmem:[%s691_s0 + $0x68] sm:$0xff]  ;;  %v46_v37 = vld [vmem:[%s691_s0 + $0x70] sm:$0xff]  ;;  %24 = vst.msk [vmem:[#allocation2 + $0x40] sm:$0xff] %vm15_vm0, %v482_v40 }
   0xb   :  { %v39_v38 = vld [vmem:[%s691_s0 + $0x38] sm:$0xff]  ;;  %26 = vst.msk [vmem:[#allocation2 + $0x50] sm:$0xff] %vm15_vm0, %v482_v40  ;;  %27 = vst.msk [vmem:[#allocation2 + $0x58] sm:$0xff] %vm15_vm0, %v482_v40  ;;  %v218_v9 = vld [vmem:[#allocation2 + $0x48] sm:$0xff] }
   0xc   :  { %v47_v39 = vld [vmem:[%s691_s0 + $0x78] sm:$0xff]  ;;  %28 = vst.msk [vmem:[#allocation2 + $0x60] sm:$0xff] %vm15_vm0, %v482_v40  ;;  %29 = vst.msk [vmem:[#allocation2 + $0x68] sm:$0xff] %vm15_vm0, %v482_v40  ;;  %v209_v15 = vld [vmem:[#allocation2] sm:$0xff] }
   0xd   :  { %440 = vmatpush3.bf16.xpose.msra.mxu0 %v437_v5  ;;  %474 = vmatpush3.bf16.xpose.msra.mxu1 %v437_v5  ;;  %30 = vst.msk [vmem:[#allocation2 + $0x70] sm:$0xff] %vm15_vm0, %v482_v40  ;;  %31 = vst.msk [vmem:[#allocation2 + $0x78] sm:$0xff] %vm15_vm0, %v482_v40 }
   0xe   :  { %442 = vmatprep.subr.bf16.mxu0 %v441_v10  ;;  %467 = vmatprep.subr.bf16.mxu1 %v441_v10 }
  0x11   :  { %v217_v21 = vld [vmem:[#allocation2 + $0x40] sm:$0xff] }
  0x15   :  { %444 = vmatpush3.bf16.xpose.msra.mxu0 %v441_v10  ;;  %475 = vmatpush3.bf16.xpose.msra.mxu1 %v441_v10  ;;  %v210_v10 = vld [vmem:[#allocation2 + $0x8] sm:$0xff] }
  0x16   :  { %446 = vmatprep.subr.bf16.mxu0 %v445_v13  ;;  %468 = vmatprep.subr.bf16.mxu1 %v445_v13 }
  0x1d   :  { %448 = vmatpush3.bf16.xpose.msra.mxu0 %v445_v13  ;;  %476 = vmatpush3.bf16.xpose.msra.mxu1 %v445_v13 }
  0x1e   :  { %450 = vmatprep.subr.bf16.mxu0 %v449_v16  ;;  %469 = vmatprep.subr.bf16.mxu1 %v449_v16 }
  0x25   :  { %452 = vmatpush3.bf16.xpose.msra.mxu0 %v449_v16  ;;  %477 = vmatpush3.bf16.xpose.msra.mxu1 %v449_v16  ;;  %v212_v16 = vld [vmem:[#allocation2 + $0x18] sm:$0xff] }
  0x26   :  { %454 = vmatprep.subr.bf16.mxu0 %v453_v19  ;;  %470 = vmatprep.subr.bf16.mxu1 %v453_v19 }
  0x2d   :  { %456 = vmatpush3.bf16.xpose.msra.mxu0 %v453_v19  ;;  %478 = vmatpush3.bf16.xpose.msra.mxu1 %v453_v19 }
  0x2e   :  { %458 = vmatprep.subr.bf16.mxu0 %v457_v22  ;;  %471 = vmatprep.subr.bf16.mxu1 %v457_v22 }
  0x35   :  { %460 = vmatpush3.bf16.xpose.msra.mxu0 %v457_v22  ;;  %479 = vmatpush3.bf16.xpose.msra.mxu1 %v457_v22  ;;  %v220_v22 = vld [vmem:[#allocation2 + $0x58] sm:$0xff] }
  0x36   :  { %462 = vmatprep.subr.bf16.mxu0 %v461_v25  ;;  %472 = vmatprep.subr.bf16.mxu1 %v461_v25 }
  0x3d   :  { %464 = vmatpush3.bf16.xpose.msra.mxu0 %v461_v25  ;;  %480 = vmatpush3.bf16.xpose.msra.mxu1 %v461_v25 }
  0x44   :  { %410 = vmatmul.mubr.f32.vlgmr.msra.gmra.mrb[0].mxu0 %v33_v26  ;;  %422 = vmatmul.mubr.f32.vlgmr.msra.gmra.mrb[0].mxu1 %v41_v27  ;;  %v219_v27 = vld [vmem:[#allocation2 + $0x50] sm:$0xff] }
  0x45   :  { %412 = vmatprep.mubr.f32.mxu0 %v34_v28  ;;  %424 = vmatprep.mubr.f32.mxu1 %v42_v29 }
  0x48   :  { %413 = vmatmul.mubr.f32.gmra.mrb[2].mxu0 %v35_v30  ;;  %425 = vmatmul.mubr.f32.gmra.mrb[2].mxu1 %v43_v31  ;;  %v211_v30 = vld [vmem:[#allocation2 + $0x10] sm:$0xff] }
  0x49   :  { %415 = vmatprep.mubr.f32.mxu0 %v36_v32  ;;  %427 = vmatprep.mubr.f32.mxu1 %v44_v33 }
  0x4c   :  { %416 = vmatmul.mubr.f32.gmra.mrb[4].mxu0 %v37_v34  ;;  %428 = vmatmul.mubr.f32.gmra.mrb[4].mxu1 %v45_v35  ;;  %v214_v35 = vld [vmem:[#allocation2 + $0x28] sm:$0xff] }
  0x4d   :  { %418 = vmatprep.mubr.f32.mxu0 %v38_v36  ;;  %430 = vmatprep.mubr.f32.mxu1 %v46_v37 }
  0x50   :  { %419 = vmatmul.mubr.f32.gmra.mrb[6].mxu0 %v39_v38  ;;  %431 = vmatmul.mubr.f32.gmra.mrb[6].mxu1 %v47_v39  ;;  %v213_v38 = vld [vmem:[#allocation2 + $0x20] sm:$0xff] }
 0x117   :  { %v411_v41 = vpop.f32.mrb[0].mxu0  ;;  %v423_v42 = vpop.f32.mrb[0].mxu1 }
 0x118   :  { %v130_v43 = vpop.f32.mrb[1].mxu0  ;;  %v170_v44 = vpop.f32.mrb[1].mxu1  ;;  %v234_v45 = vmul.f32 %v423_v42, %v423_v42  ;;  %v226_v46 = vmul.f32 %v411_v41, %v411_v41 }
 0x119   :  { %v225_v49 = vmul.f32 %v130_v43, %v130_v43  ;;  %v233_v56 = vmul.f32 %v170_v44, %v170_v44  ;;  %v222_v43 = vld [vmem:[#allocation2 + $0x68] sm:$0xff] }
 0x11a   :  { %259 = vadd.xlane.f32.xlu1 %v234_v45  ;;  %243 = vadd.xlane.f32.xlu0 %v226_v46  ;;  %v221_v46 = vld [vmem:[#allocation2 + $0x60] sm:$0xff] }
 0x11b   :  { %v414_v47 = vpop.f32.mrb[2].mxu0  ;;  %v426_v48 = vpop.f32.mrb[2].mxu1 }
 0x11c   :  { %v228_v50 = vmul.f32 %v414_v47, %v414_v47  ;;  %v140_v51 = vpop.f32.mrb[3].mxu0  ;;  %v180_v52 = vpop.f32.mrb[3].mxu1  ;;  %v236_v53 = vmul.f32 %v426_v48, %v426_v48 }
 0x11d   :  { %v227_v61 = vmul.f32 %v140_v51, %v140_v51  ;;  %v235_v62 = vmul.f32 %v180_v52, %v180_v52  ;;  %v216_v51 = vld [vmem:[#allocation2 + $0x38] sm:$0xff] }
 0x11e   :  { %241 = vadd.xlane.f32.xlu0 %v225_v49  ;;  %247 = vadd.xlane.f32.xlu1 %v228_v50 }
 0x11f   :  { %v417_v54 = vpop.f32.mrb[4].mxu0  ;;  %v429_v55 = vpop.f32.mrb[4].mxu1 }
 0x120   :  { %v150_v57 = vpop.f32.mrb[5].mxu0  ;;  %v190_v58 = vpop.f32.mrb[5].mxu1  ;;  %v230_v1 = vmul.f32 %v417_v54, %v417_v54  ;;  %v238_v3 = vmul.f32 %v429_v55, %v429_v55  ;;  %v215_v54 = vld [vmem:[#allocation2 + $0x30] sm:$0xff] }
 0x121   :  { %v229_v2 = vmul.f32 %v150_v57, %v150_v57  ;;  %v237_v4 = vmul.f32 %v190_v58, %v190_v58 }
 0x122   :  { %257 = vadd.xlane.f32.xlu0 %v233_v56  ;;  %263 = vadd.xlane.f32.xlu1 %v236_v53 }
 0x123   :  { %v420_v59 = vpop.f32.mrb[6].mxu0  ;;  %v432_v60 = vpop.f32.mrb[6].mxu1 }
 0x124   :  { %v160_v63 = vpop.f32.mrb[7].mxu0  ;;  %v200_v0 = vpop.f32.mrb[7].mxu1  ;;  %v232_v5 = vmul.f32 %v420_v59, %v420_v59  ;;  %v240_v7 = vmul.f32 %v432_v60, %v432_v60  ;;  %v224_v59 = vld [vmem:[#allocation2 + $0x78] sm:$0xff] }
 0x125   :  { %v231_v6 = vmul.f32 %v160_v63, %v160_v63  ;;  %v239_v8 = vmul.f32 %v200_v0, %v200_v0 }
 0x126   :  { %261 = vadd.xlane.f32.xlu0 %v235_v62  ;;  %245 = vadd.xlane.f32.xlu1 %v227_v61  ;;  %v223_v62 = vld [vmem:[#allocation2 + $0x70] sm:$0xff] }
 0x12a   :  { %251 = vadd.xlane.f32.xlu1 %v230_v1  ;;  %249 = vadd.xlane.f32.xlu0 %v229_v2 }
 0x12e   :  { %267 = vadd.xlane.f32.xlu1 %v238_v3  ;;  %265 = vadd.xlane.f32.xlu0 %v237_v4 }
 0x132   :  { %255 = vadd.xlane.f32.xlu1 %v232_v5  ;;  %253 = vadd.xlane.f32.xlu0 %v231_v6 }
 0x136   :  { %271 = vadd.xlane.f32.xlu1 %v240_v7  ;;  %269 = vadd.xlane.f32.xlu0 %v239_v8 }
 0x1a7   :  { %v260_v11 = vpop.xlane.xlu1 %259  ;;  %v244_v12 = vpop.xlane.xlu0 %243 }
 0x1a8   :  { %v282_v13 = vadd.f32 %v260_v11, %v218_v9  ;;  %v274_v14 = vadd.f32 %v244_v12, %v210_v10 }
 0x1aa   :  { %299 = vst.msk [vmem:[#allocation2 + $0x48] sm:$0xff] %vm15_vm0, %v282_v13  ;;  %291 = vst.msk [vmem:[#allocation2 + $0x8] sm:$0xff] %vm15_vm0, %v274_v14 }
 0x1ab   :  { %v242_v17 = vpop.xlane.xlu0 %241  ;;  %v248_v18 = vpop.xlane.xlu1 %247 }
 0x1ac   :  { %v273_v19 = vadd.f32 %v242_v17, %v209_v15  ;;  %v276_v20 = vadd.f32 %v248_v18, %v212_v16 }
 0x1ae   :  { %290 = vst.msk [vmem:[#allocation2] sm:$0xff] %vm15_vm0, %v273_v19  ;;  %293 = vst.msk [vmem:[#allocation2 + $0x18] sm:$0xff] %vm15_vm0, %v276_v20 }
 0x1af   :  { %v258_v23 = vpop.xlane.xlu0 %257  ;;  %v264_v24 = vpop.xlane.xlu1 %263 }
 0x1b0   :  { %v281_v25 = vadd.f32 %v258_v23, %v217_v21  ;;  %v284_v26 = vadd.f32 %v264_v24, %v220_v22 }
 0x1b1   :  { %v318_v28 = vld [vmem:[#allocation2 + $0x48] sm:$0xff] }
 0x1b2   :  { %v310_v29 = vld [vmem:[#allocation2 + $0x8] sm:$0xff]  ;;  %334 = vst.msk [vmem:[%s692_s2 + $0x48] sm:$0xff] %vm15_vm0, %v318_v28  ;;  %298 = vst.msk [vmem:[#allocation2 + $0x40] sm:$0xff] %vm15_vm0, %v281_v25 }
 0x1b3   :  { %326 = vst.msk [vmem:[%s692_s2 + $0x8] sm:$0xff] %vm15_vm0, %v310_v29  ;;  %301 = vst.msk [vmem:[#allocation2 + $0x58] sm:$0xff] %vm15_vm0, %v284_v26  ;;  %v262_v31 = vpop.xlane.xlu0 %261  ;;  %v246_v32 = vpop.xlane.xlu1 %245 }
 0x1b4   :  { %v283_v33 = vadd.f32 %v262_v31, %v219_v27  ;;  %v275_v34 = vadd.f32 %v246_v32, %v211_v30 }
 0x1b5   :  { %v309_v36 = vld [vmem:[#allocation2] sm:$0xff]  ;;  %v312_v37 = vld [vmem:[#allocation2 + $0x18] sm:$0xff] }
 0x1b6   :  { %325 = vst.msk [vmem:[%s692_s2] sm:$0xff] %vm15_vm0, %v309_v36  ;;  %328 = vst.msk [vmem:[%s692_s2 + $0x18] sm:$0xff] %vm15_vm0, %v312_v37 }
 0x1b7   :  { %300 = vst.msk [vmem:[#allocation2 + $0x50] sm:$0xff] %vm15_vm0, %v283_v33  ;;  %292 = vst.msk [vmem:[#allocation2 + $0x10] sm:$0xff] %vm15_vm0, %v275_v34  ;;  %v252_v39 = vpop.xlane.xlu1 %251  ;;  %v250_v40 = vpop.xlane.xlu0 %249 }
 0x1b8   :  { %v278_v41 = vadd.f32 %v252_v39, %v214_v35  ;;  %v277_v42 = vadd.f32 %v250_v40, %v213_v38 }
 0x1b9   :  { %v317_v44 = vld [vmem:[#allocation2 + $0x40] sm:$0xff] }
 0x1ba   :  { %v320_v45 = vld [vmem:[#allocation2 + $0x58] sm:$0xff]  ;;  %333 = vst.msk [vmem:[%s692_s2 + $0x40] sm:$0xff] %vm15_vm0, %v317_v44  ;;  %295 = vst.msk [vmem:[#allocation2 + $0x28] sm:$0xff] %vm15_vm0, %v278_v41 }
 0x1bb   :  { %336 = vst.msk [vmem:[%s692_s2 + $0x58] sm:$0xff] %vm15_vm0, %v320_v45  ;;  %294 = vst.msk [vmem:[#allocation2 + $0x20] sm:$0xff] %vm15_vm0, %v277_v42  ;;  %v268_v47 = vpop.xlane.xlu1 %267  ;;  %v266_v48 = vpop.xlane.xlu0 %265 }
 0x1bc   :  { %v286_v49 = vadd.f32 %v268_v47, %v222_v43  ;;  %v285_v50 = vadd.f32 %v266_v48, %v221_v46 }
 0x1be   :  { %v319_v52 = vld [vmem:[#allocation2 + $0x50] sm:$0xff]  ;;  %303 = vst.msk [vmem:[#allocation2 + $0x68] sm:$0xff] %vm15_vm0, %v286_v49  ;;  %302 = vst.msk [vmem:[#allocation2 + $0x60] sm:$0xff] %vm15_vm0, %v285_v50 }
 0x1bf   :  { %v311_v53 = vld [vmem:[#allocation2 + $0x10] sm:$0xff]  ;;  %335 = vst.msk [vmem:[%s692_s2 + $0x50] sm:$0xff] %vm15_vm0, %v319_v52  ;;  %v256_v55 = vpop.xlane.xlu1 %255  ;;  %v254_v56 = vpop.xlane.xlu0 %253 }
 0x1c0   :  { %327 = vst.msk [vmem:[%s692_s2 + $0x10] sm:$0xff] %vm15_vm0, %v311_v53  ;;  %v280_v57 = vadd.f32 %v256_v55, %v216_v51  ;;  %v279_v58 = vadd.f32 %v254_v56, %v215_v54 }
 0x1c1   :  { %v314_v60 = vld [vmem:[#allocation2 + $0x28] sm:$0xff] }
 0x1c2   :  { %v313_v61 = vld [vmem:[#allocation2 + $0x20] sm:$0xff]  ;;  %330 = vst.msk [vmem:[%s692_s2 + $0x28] sm:$0xff] %vm15_vm0, %v314_v60  ;;  %297 = vst.msk [vmem:[#allocation2 + $0x38] sm:$0xff] %vm15_vm0, %v280_v57 }
 0x1c3   :  { %329 = vst.msk [vmem:[%s692_s2 + $0x20] sm:$0xff] %vm15_vm0, %v313_v61  ;;  %296 = vst.msk [vmem:[#allocation2 + $0x30] sm:$0xff] %vm15_vm0, %v279_v58  ;;  %v272_v63 = vpop.xlane.xlu1 %271  ;;  %v270_v0 = vpop.xlane.xlu0 %269 }
 0x1c4   :  { %v288_v1 = vadd.f32 %v272_v63, %v224_v59  ;;  %v287_v2 = vadd.f32 %v270_v0, %v223_v62 }
 0x1c5   :  { %v322_v3 = vld [vmem:[#allocation2 + $0x68] sm:$0xff]  ;;  %v321_v4 = vld [vmem:[#allocation2 + $0x60] sm:$0xff] }
 0x1c6   :  { %338 = vst.msk [vmem:[%s692_s2 + $0x68] sm:$0xff] %vm15_vm0, %v322_v3  ;;  %337 = vst.msk [vmem:[%s692_s2 + $0x60] sm:$0xff] %vm15_vm0, %v321_v4 }
 0x1c7   :  { %305 = vst.msk [vmem:[#allocation2 + $0x78] sm:$0xff] %vm15_vm0, %v288_v1  ;;  %304 = vst.msk [vmem:[#allocation2 + $0x70] sm:$0xff] %vm15_vm0, %v287_v2 }
 0x1c9   :  { %v316_v5 = vld [vmem:[#allocation2 + $0x38] sm:$0xff] }
 0x1ca   :  { %v315_v6 = vld [vmem:[#allocation2 + $0x30] sm:$0xff]  ;;  %332 = vst.msk [vmem:[%s692_s2 + $0x38] sm:$0xff] %vm15_vm0, %v316_v5 }
 0x1cb   :  { %331 = vst.msk [vmem:[%s692_s2 + $0x30] sm:$0xff] %vm15_vm0, %v315_v6 }
 0x1ce   :  { %v324_v7 = vld [vmem:[#allocation2 + $0x78] sm:$0xff]  ;;  %v323_v8 = vld [vmem:[#allocation2 + $0x70] sm:$0xff] }
 0x1cf   :  { %340 = vst.msk [vmem:[%s692_s2 + $0x78] sm:$0xff] %vm15_vm0, %v324_v7  ;;  %339 = vst.msk [vmem:[%s692_s2 + $0x70] sm:$0xff] %vm15_vm0, %v323_v8 }

// kernel: global_gnn_forward.9
= control target key start
LH: loop header
LB: loop body
LE: loop exit
PB: predicated region body
PF: predicated region fallthrough
CT: control target
= control target key end

     0   :  { %s1149_s1 = inlined_call_operand.vmem [shape: f32[128,128], index: 1, kind: input, shape index: {}]   ;;  %s1150_s0 = inlined_call_operand.vmem [shape: f32[128,128], index: 0, kind: input, shape index: {}]   ;;  %s1151_s3 = inlined_call_operand.vmem [shape: f32[128,256], index: 3, kind: input, shape index: {}]   ;;  %s1152_s2 = inlined_call_operand.vmem [shape: f32[128,256], index: 2, kind: input, shape index: {}]   ;;  %s1153_s4 = inlined_call_operand.vmem [shape: f32[128,128], index: 4, kind: output, shape index: {}]  }
   0x1   :  { %v69_v0 = vld [vmem:[%s1149_s1] sm:$0xff]  ;;  %v70_v1 = vld [vmem:[%s1149_s1 + $0x8] sm:$0xff]  ;;  %v71_v2 = vld [vmem:[%s1149_s1 + $0x10] sm:$0xff] }
   0x2   :  { %v678_v3 = vpack.c.bf16 %v70_v1, %v69_v0  ;;  %v72_v4 = vld [vmem:[%s1149_s1 + $0x18] sm:$0xff]  ;;  %v73_v6 = vld [vmem:[%s1149_s1 + $0x20] sm:$0xff]  ;;  %v74_v7 = vld [vmem:[%s1149_s1 + $0x28] sm:$0xff] }
   0x3   :  { %v682_v5 = vpack.c.bf16 %v72_v4, %v71_v2  ;;  %v686_v8 = vpack.c.bf16 %v74_v7, %v73_v6  ;;  %v53_v9 = vld [vmem:[%s1150_s0] sm:$0xff]  ;;  %v75_v10 = vld [vmem:[%s1149_s1 + $0x30] sm:$0xff]  ;;  %v76_v11 = vld [vmem:[%s1149_s1 + $0x38] sm:$0xff] }
   0x4   :  { %679 = vmatprep.subr.bf16.mxu0 %v678_v3  ;;  %654 = vmatprep.mubr.f32.mxu0 %v53_v9  ;;  %v690_v12 = vpack.c.bf16 %v76_v11, %v75_v10  ;;  %v77_v13 = vld [vmem:[%s1149_s1 + $0x40] sm:$0xff]  ;;  %v78_v14 = vld [vmem:[%s1149_s1 + $0x48] sm:$0xff]  ;;  %v284_v16 = vld [vmem:[%s1151_s3 + $0x18] sm:$0xff] }
   0x5   :  { %681 = vmatpush3.bf16.msra.mxu0 %v678_v3  ;;  %v282_v15 = vld [vmem:[%s1151_s3 + $0x8] sm:$0xff]  ;;  %v281_v17 = vld [vmem:[%s1151_s3] sm:$0xff]  ;;  %v283_v18 = vld [vmem:[%s1151_s3 + $0x10] sm:$0xff]  ;;  %v694_v22 = vpack.c.bf16 %v78_v14, %v77_v13 }
   0x6   :  { %683 = vmatprep.subr.bf16.mxu0 %v682_v5  ;;  %v830_v19 = vpack.c.bf16 %v284_v16, %v282_v15  ;;  %v286_v20 = vld [vmem:[%s1151_s3 + $0x28] sm:$0xff]  ;;  %v288_v21 = vld [vmem:[%s1151_s3 + $0x38] sm:$0xff]  ;;  %v79_v23 = vld [vmem:[%s1149_s1 + $0x50] sm:$0xff]  ;;  %v841_v24 = vpack.c.bf16 %v283_v18, %v281_v17 }
   0x7   :  { %v80_v25 = vld [vmem:[%s1149_s1 + $0x58] sm:$0xff]  ;;  %v846_v26 = vpack.c.bf16 %v288_v21, %v286_v20  ;;  %v285_v27 = vld [vmem:[%s1151_s3 + $0x20] sm:$0xff]  ;;  %v287_v28 = vld [vmem:[%s1151_s3 + $0x30] sm:$0xff] }
   0x8   :  { %742 = vmatprep.subr.bf16.mxu1 %v830_v19  ;;  %v290_v29 = vld [vmem:[%s1151_s3 + $0x48] sm:$0xff]  ;;  %v292_v30 = vld [vmem:[%s1151_s3 + $0x58] sm:$0xff]  ;;  %v698_v31 = vpack.c.bf16 %v80_v25, %v79_v23  ;;  %v81_v32 = vld [vmem:[%s1149_s1 + $0x60] sm:$0xff]  ;;  %v866_v33 = vpack.c.bf16 %v287_v28, %v285_v27 }
   0x9   :  { %685 = vmatpush3.bf16.msra.mxu0 %v682_v5  ;;  %750 = vmatpush1.bf16.msra.mxu1 %v841_v24  ;;  %v82_v34 = vld [vmem:[%s1149_s1 + $0x68] sm:$0xff]  ;;  %v871_v35 = vpack.c.bf16 %v292_v30, %v290_v29  ;;  %v289_v36 = vld [vmem:[%s1151_s3 + $0x40] sm:$0xff]  ;;  %v291_v37 = vld [vmem:[%s1151_s3 + $0x50] sm:$0xff] }
   0xa   :  { %687 = vmatprep.subr.bf16.mxu0 %v686_v8  ;;  %743 = vmatprep.subr.bf16.mxu1 %v846_v26  ;;  %v294_v38 = vld [vmem:[%s1151_s3 + $0x68] sm:$0xff]  ;;  %v296_v39 = vld [vmem:[%s1151_s3 + $0x78] sm:$0xff]  ;;  %v702_v40 = vpack.c.bf16 %v82_v34, %v81_v32  ;;  %v83_v41 = vld [vmem:[%s1149_s1 + $0x70] sm:$0xff]  ;;  %v890_v42 = vpack.c.bf16 %v291_v37, %v289_v36 }
   0xb   :  { %v84_v43 = vld [vmem:[%s1149_s1 + $0x78] sm:$0xff]  ;;  %v895_v44 = vpack.c.bf16 %v296_v39, %v294_v38  ;;  %v293_v45 = vld [vmem:[%s1151_s3 + $0x60] sm:$0xff]  ;;  %v295_v46 = vld [vmem:[%s1151_s3 + $0x70] sm:$0xff] }
   0xc   :  { %v298_v47 = vld [vmem:[%s1151_s3 + $0x88] sm:$0xff]  ;;  %v300_v48 = vld [vmem:[%s1151_s3 + $0x98] sm:$0xff]  ;;  %v706_v49 = vpack.c.bf16 %v84_v43, %v83_v41  ;;  %v724_v50 = vpack.c.bf16 %v295_v46, %v293_v45  ;;  %v297_v52 = vld [vmem:[%s1151_s3 + $0x80] sm:$0xff] }
   0xd   :  { %689 = vmatpush3.bf16.msra.mxu0 %v686_v8  ;;  %751 = vmatpush1.bf16.msra.mxu1 %v866_v33  ;;  %v726_v51 = vpack.c.bf16 %v300_v48, %v298_v47  ;;  %v299_v53 = vld [vmem:[%s1151_s3 + $0x90] sm:$0xff]  ;;  %v302_v54 = vld [vmem:[%s1151_s3 + $0xa8] sm:$0xff]  ;;  %v304_v55 = vld [vmem:[%s1151_s3 + $0xb8] sm:$0xff] }
   0xe   :  { %691 = vmatprep.subr.bf16.mxu0 %v690_v12  ;;  %744 = vmatprep.subr.bf16.mxu1 %v871_v35  ;;  %v728_v56 = vpack.c.bf16 %v299_v53, %v297_v52  ;;  %v730_v57 = vpack.c.bf16 %v304_v55, %v302_v54  ;;  %v301_v58 = vld [vmem:[%s1151_s3 + $0xa0] sm:$0xff]  ;;  %v303_v59 = vld [vmem:[%s1151_s3 + $0xb0] sm:$0xff]  ;;  %v54_v60 = vld [vmem:[%s1150_s0 + $0x8] sm:$0xff] }
   0xf   :  { %v306_v61 = vld [vmem:[%s1151_s3 + $0xc8] sm:$0xff]  ;;  %v308_v62 = vld [vmem:[%s1151_s3 + $0xd8] sm:$0xff]  ;;  %v55_v63 = vld [vmem:[%s1150_s0 + $0x10] sm:$0xff]  ;;  %v732_v0 = vpack.c.bf16 %v303_v59, %v301_v58 }
  0x10   :  { %v305_v1 = vld [vmem:[%s1151_s3 + $0xc0] sm:$0xff]  ;;  %v307_v2 = vld [vmem:[%s1151_s3 + $0xd0] sm:$0xff]  ;;  %v734_v3 = vpack.c.bf16 %v308_v62, %v306_v61  ;;  %v56_v4 = vld [vmem:[%s1150_s0 + $0x18] sm:$0xff] }
  0x11   :  { %693 = vmatpush3.bf16.msra.mxu0 %v690_v12  ;;  %752 = vmatpush1.bf16.msra.mxu1 %v890_v42  ;;  %v310_v5 = vld [vmem:[%s1151_s3 + $0xe8] sm:$0xff]  ;;  %v312_v6 = vld [vmem:[%s1151_s3 + $0xf8] sm:$0xff]  ;;  %v57_v7 = vld [vmem:[%s1150_s0 + $0x20] sm:$0xff]  ;;  %v736_v8 = vpack.c.bf16 %v307_v2, %v305_v1 }
  0x12   :  { %695 = vmatprep.subr.bf16.mxu0 %v694_v22  ;;  %745 = vmatprep.subr.bf16.mxu1 %v895_v44  ;;  %v309_v9 = vld [vmem:[%s1151_s3 + $0xe0] sm:$0xff]  ;;  %v311_v10 = vld [vmem:[%s1151_s3 + $0xf0] sm:$0xff]  ;;  %v738_v11 = vpack.c.bf16 %v312_v6, %v310_v5  ;;  %v58_v12 = vld [vmem:[%s1150_s0 + $0x28] sm:$0xff] }
  0x13   :  { %v59_v13 = vld [vmem:[%s1150_s0 + $0x30] sm:$0xff]  ;;  %v740_v14 = vpack.c.bf16 %v311_v10, %v309_v9  ;;  %v60_v15 = vld [vmem:[%s1150_s0 + $0x38] sm:$0xff]  ;;  %v61_v16 = vld [vmem:[%s1150_s0 + $0x40] sm:$0xff] }
  0x14   :  { %v62_v17 = vld [vmem:[%s1150_s0 + $0x48] sm:$0xff]  ;;  %v63_v18 = vld [vmem:[%s1150_s0 + $0x50] sm:$0xff]  ;;  %v65_v20 = vld [vmem:[%s1150_s0 + $0x60] sm:$0xff] }
  0x15   :  { %697 = vmatpush3.bf16.msra.mxu0 %v694_v22  ;;  %753 = vmatpush1.bf16.msra.mxu1 %v724_v50  ;;  %v66_v21 = vld [vmem:[%s1150_s0 + $0x68] sm:$0xff]  ;;  %v67_v22 = vld [vmem:[%s1150_s0 + $0x70] sm:$0xff]  ;;  %v68_v23 = vld [vmem:[%s1150_s0 + $0x78] sm:$0xff] }
  0x16   :  { %699 = vmatprep.subr.bf16.mxu0 %v698_v31  ;;  %746 = vmatprep.subr.bf16.mxu1 %v726_v51  ;;  %v474_v41 = vld [vmem:[%s1152_s2] sm:$0xff]  ;;  %v476_v45 = vld [vmem:[%s1152_s2 + $0x10] sm:$0xff]  ;;  %v475_v47 = vld [vmem:[%s1152_s2 + $0x8] sm:$0xff] }
  0x17   :  { %v478_v52 = vld [vmem:[%s1152_s2 + $0x20] sm:$0xff]  ;;  %v484_v1 = vld [vmem:[%s1152_s2 + $0x50] sm:$0xff]  ;;  %v479_v5 = vld [vmem:[%s1152_s2 + $0x28] sm:$0xff] }
  0x18   :  { %v482_v53 = vld [vmem:[%s1152_s2 + $0x40] sm:$0xff]  ;;  %v483_v6 = vld [vmem:[%s1152_s2 + $0x48] sm:$0xff] }
  0x19   :  { %701 = vmatpush3.bf16.msra.mxu0 %v698_v31  ;;  %754 = vmatpush1.bf16.msra.mxu1 %v728_v56 }
  0x1a   :  { %703 = vmatprep.subr.bf16.mxu0 %v702_v40  ;;  %747 = vmatprep.subr.bf16.mxu1 %v730_v57 }
  0x1d   :  { %705 = vmatpush3.bf16.msra.mxu0 %v702_v40  ;;  %755 = vmatpush1.bf16.msra.mxu1 %v732_v0 }
  0x1e   :  { %707 = vmatprep.subr.bf16.mxu0 %v706_v49  ;;  %748 = vmatprep.subr.bf16.mxu1 %v734_v3 }
  0x21   :  { %709 = vmatpush3.bf16.msra.mxu0 %v706_v49  ;;  %756 = vmatpush1.bf16.msra.mxu1 %v736_v8 }
  0x22   :  { %711 = vmatprep.subr.bf16.mxu0 %v830_v19  ;;  %749 = vmatprep.subr.bf16.mxu1 %v738_v11  ;;  %v64_v19 = vld [vmem:[%s1150_s0 + $0x58] sm:$0xff] }
  0x24   :  { %655 = vmatmul.mubr.f32.vlgmr.msra.gmra.mrb[0].mxu0 %v54_v60 }
  0x25   :  { %657 = vmatprep.mubr.f32.mxu0 %v55_v63  ;;  %713 = vmatpush1.bf16.msra.mxu0 %v841_v24  ;;  %v759_v24 = vmov 0.0  }
  0x26   :  { %715 = vmatprep.subr.bf16.mxu0 %v846_v26  ;;  %757 = vmatpush1.bf16.msra.mxu1 %v740_v14 }
  0x27   :  { %401 = vmatprep.mubr.f32.mxu1 %v759_v24 }
  0x28   :  { %658 = vmatmul.mubr.f32.gmra.mrb[2].mxu0 %v56_v4 }
  0x29   :  { %660 = vmatprep.mubr.f32.mxu0 %v57_v7  ;;  %717 = vmatpush1.bf16.msra.mxu0 %v866_v33 }
  0x2a   :  { %719 = vmatprep.subr.bf16.mxu0 %v871_v35 }
  0x2c   :  { %661 = vmatmul.mubr.f32.gmra.mrb[4].mxu0 %v58_v12 }
  0x2d   :  { %663 = vmatprep.mubr.f32.mxu0 %v59_v13  ;;  %721 = vmatpush1.bf16.msra.mxu0 %v890_v42 }
  0x2e   :  { %723 = vmatprep.subr.bf16.mxu0 %v895_v44 }
  0x30   :  { %664 = vmatmul.mubr.f32.gmra.mrb[6].mxu0 %v60_v15  ;;  %v486_v15 = vld [vmem:[%s1152_s2 + $0x60] sm:$0xff] }
  0x31   :  { %666 = vmatprep.mubr.f32.mxu0 %v61_v16  ;;  %725 = vmatpush1.bf16.msra.mxu0 %v724_v50 }
  0x32   :  { %727 = vmatprep.subr.bf16.mxu0 %v726_v51 }
  0x34   :  { %667 = vmatmul.mubr.f32.gmra.mrb[8].mxu0 %v62_v17 }
  0x35   :  { %669 = vmatprep.mubr.f32.mxu0 %v63_v18  ;;  %729 = vmatpush1.bf16.msra.mxu0 %v728_v56  ;;  %v477_v56 = vld [vmem:[%s1152_s2 + $0x18] sm:$0xff] }
  0x36   :  { %731 = vmatprep.subr.bf16.mxu0 %v730_v57 }
  0x38   :  { %670 = vmatmul.mubr.f32.gmra.mrb[10].mxu0 %v64_v19 }
  0x39   :  { %672 = vmatprep.mubr.f32.mxu0 %v65_v20  ;;  %733 = vmatpush1.bf16.msra.mxu0 %v732_v0  ;;  %v480_v0 = vld [vmem:[%s1152_s2 + $0x30] sm:$0xff]  ;;  %v481_v20 = vld [vmem:[%s1152_s2 + $0x38] sm:$0xff] }
  0x3a   :  { %735 = vmatprep.subr.bf16.mxu0 %v734_v3 }
  0x3c   :  { %673 = vmatmul.mubr.f32.gmra.mrb[12].mxu0 %v66_v21  ;;  %v485_v21 = vld [vmem:[%s1152_s2 + $0x58] sm:$0xff] }
  0x3d   :  { %675 = vmatprep.mubr.f32.mxu0 %v67_v22  ;;  %737 = vmatpush1.bf16.msra.mxu0 %v736_v8 }
  0x3e   :  { %739 = vmatprep.subr.bf16.mxu0 %v738_v11 }
  0x40   :  { %676 = vmatmul.mubr.f32.gmra.mrb[14].mxu0 %v68_v23 }
  0x41   :  { %741 = vmatpush1.bf16.msra.mxu0 %v740_v14  ;;  %377 = vmatprep.mubr.f32.mxu0 %v759_v24 }
  0xf7   :  { %v656_v25 = vpop.f32.mrb[0].mxu0 }
  0xf8   :  { %v151_v26 = vpop.f32.mrb[1].mxu0 }
  0xf9   :  { %378 = vmatmul.mubr.f32.vlgmr.msra.gmra.mrb[16].mxu0 %v151_v26 }
  0xfa   :  { %383 = vmatprep.mubr.f32.mxu0 %v759_v24 }
  0xfb   :  { %v659_v27 = vpop.f32.mrb[2].mxu0 }
  0xfc   :  { %v161_v28 = vpop.f32.mrb[3].mxu0 }
  0xfd   :  { %384 = vmatmul.mubr.f32.gmra.mrb[18].mxu0 %v656_v25 }
  0xfe   :  { %389 = vmatprep.mubr.f32.mxu0 %v759_v24 }
  0xff   :  { %v662_v29 = vpop.f32.mrb[4].mxu0 }
 0x100   :  { %v171_v30 = vpop.f32.mrb[5].mxu0 }
 0x101   :  { %390 = vmatmul.mubr.f32.gmra.mrb[20].mxu0 %v161_v28  ;;  %402 = vmatmul.mubr.f32.vlgmr.msra.gmra.mrb[0].mxu1 %v171_v30 }
 0x102   :  { %395 = vmatprep.mubr.f32.mxu0 %v759_v24  ;;  %407 = vmatprep.mubr.f32.mxu1 %v759_v24 }
 0x103   :  { %v665_v31 = vpop.f32.mrb[6].mxu0 }
 0x104   :  { %v181_v32 = vpop.f32.mrb[7].mxu0 }
 0x105   :  { %396 = vmatmul.mubr.f32.gmra.mrb[22].mxu0 %v659_v27  ;;  %408 = vmatmul.mubr.f32.gmra.mrb[2].mxu1 %v662_v29  ;;  %v488_v27 = vld [vmem:[%s1152_s2 + $0x70] sm:$0xff] }
 0x106   :  { %413 = vmatprep.mubr.f32.mxu1 %v759_v24 }
 0x107   :  { %v668_v33 = vpop.f32.mrb[8].mxu0 }
 0x108   :  { %v191_v34 = vpop.f32.mrb[9].mxu0 }
 0x109   :  { %414 = vmatmul.mubr.f32.gmra.mrb[4].mxu1 %v181_v32 }
 0x10a   :  { %419 = vmatprep.mubr.f32.mxu1 %v759_v24 }
 0x10b   :  { %v671_v35 = vpop.f32.mrb[10].mxu0 }
 0x10c   :  { %v201_v36 = vpop.f32.mrb[11].mxu0 }
 0x10d   :  { %420 = vmatmul.mubr.f32.gmra.mrb[6].mxu1 %v665_v31  ;;  %v487_v31 = vld [vmem:[%s1152_s2 + $0x68] sm:$0xff] }
 0x10e   :  { %425 = vmatprep.mubr.f32.mxu1 %v759_v24 }
 0x10f   :  { %v674_v37 = vpop.f32.mrb[12].mxu0 }
 0x110   :  { %v211_v38 = vpop.f32.mrb[13].mxu0 }
 0x111   :  { %426 = vmatmul.mubr.f32.gmra.mrb[8].mxu1 %v191_v34 }
 0x112   :  { %431 = vmatprep.mubr.f32.mxu1 %v759_v24 }
 0x113   :  { %v677_v39 = vpop.f32.mrb[14].mxu0 }
 0x114   :  { %v221_v40 = vpop.f32.mrb[15].mxu0 }
 0x115   :  { %432 = vmatmul.mubr.f32.gmra.mrb[10].mxu1 %v668_v33 }
 0x116   :  { %437 = vmatprep.mubr.f32.mxu1 %v759_v24 }
 0x119   :  { %438 = vmatmul.mubr.f32.gmra.mrb[12].mxu1 %v201_v36  ;;  %v490_v36 = vld [vmem:[%s1152_s2 + $0x80] sm:$0xff] }
 0x11a   :  { %443 = vmatprep.mubr.f32.mxu1 %v759_v24 }
 0x11d   :  { %444 = vmatmul.mubr.f32.gmra.mrb[14].mxu1 %v671_v35 }
 0x11e   :  { %449 = vmatprep.mubr.f32.mxu1 %v759_v24 }
 0x121   :  { %450 = vmatmul.mubr.f32.gmra.mrb[16].mxu1 %v211_v38 }
 0x122   :  { %455 = vmatprep.mubr.f32.mxu1 %v759_v24 }
 0x125   :  { %456 = vmatmul.mubr.f32.gmra.mrb[18].mxu1 %v674_v37 }
 0x126   :  { %461 = vmatprep.mubr.f32.mxu1 %v759_v24 }
 0x129   :  { %462 = vmatmul.mubr.f32.gmra.mrb[20].mxu1 %v221_v40 }
 0x12a   :  { %467 = vmatprep.mubr.f32.mxu1 %v759_v24 }
 0x12d   :  { %468 = vmatmul.mubr.f32.gmra.mrb[22].mxu1 %v677_v39  ;;  %v489_v39 = vld [vmem:[%s1152_s2 + $0x78] sm:$0xff] }
 0x1cc   :  { %v379_v42 = vpop.f32.mrb[16].mxu0 }
 0x1cd   :  { %v506_v43 = vadd.f32 %v474_v41, %v379_v42  ;;  %v381_v44 = vpop.f32.mrb[17].mxu0 }
 0x1cf   :  { %v522_v46 = vmax.f32 %v506_v43, 0.0 }
 0x1d0   :  { %v385_v48 = vpop.f32.mrb[18].mxu0 }
 0x1d1   :  { %v538_v49 = vmul.f32 %v522_v46, %v381_v44  ;;  %v507_v50 = vadd.f32 %v476_v45, %v385_v48  ;;  %v387_v51 = vpop.f32.mrb[19].mxu0  ;;  %v492_v44 = vld [vmem:[%s1152_s2 + $0x90] sm:$0xff] }
 0x1d3   :  { %v554_v54 = vadd.f32 %v538_v49, %v475_v47  ;;  %v523_v55 = vmax.f32 %v507_v50, 0.0  ;;  %v491_v47 = vld [vmem:[%s1152_s2 + $0x88] sm:$0xff] }
 0x1d4   :  { %v391_v57 = vpop.f32.mrb[20].mxu0  ;;  %v403_v58 = vpop.f32.mrb[0].mxu1 }
 0x1d5   :  { %570 = vst [vmem:[%s1153_s4] sm:$0xff] %v554_v54  ;;  %v539_v59 = vmul.f32 %v523_v55, %v387_v51  ;;  %v508_v60 = vadd.f32 %v478_v52, %v391_v57  ;;  %v510_v61 = vadd.f32 %v482_v53, %v403_v58  ;;  %v393_v62 = vpop.f32.mrb[21].mxu0  ;;  %v405_v63 = vpop.f32.mrb[1].mxu1  ;;  %v494_v52 = vld [vmem:[%s1152_s2 + $0xa0] sm:$0xff]  ;;  %v493_v55 = vld [vmem:[%s1152_s2 + $0x98] sm:$0xff] }
 0x1d7   :  { %v555_v2 = vadd.f32 %v539_v59, %v477_v56  ;;  %v524_v3 = vmax.f32 %v508_v60, 0.0  ;;  %v526_v4 = vmax.f32 %v510_v61, 0.0  ;;  %v496_v60 = vld [vmem:[%s1152_s2 + $0xb0] sm:$0xff] }
 0x1d8   :  { %v397_v7 = vpop.f32.mrb[22].mxu0  ;;  %v409_v8 = vpop.f32.mrb[2].mxu1 }
 0x1d9   :  { %571 = vst [vmem:[%s1153_s4 + $0x8] sm:$0xff] %v555_v2  ;;  %v540_v9 = vmul.f32 %v524_v3, %v393_v62  ;;  %v542_v10 = vmul.f32 %v526_v4, %v405_v63  ;;  %v509_v11 = vadd.f32 %v480_v0, %v397_v7  ;;  %v511_v12 = vadd.f32 %v484_v1, %v409_v8  ;;  %v399_v13 = vpop.f32.mrb[23].mxu0  ;;  %v411_v14 = vpop.f32.mrb[3].mxu1  ;;  %v495_v63 = vld [vmem:[%s1152_s2 + $0xa8] sm:$0xff]  ;;  %v498_v4 = vld [vmem:[%s1152_s2 + $0xc0] sm:$0xff]  ;;  %v497_v7 = vld [vmem:[%s1152_s2 + $0xb8] sm:$0xff] }
 0x1db   :  { %v556_v16 = vadd.f32 %v540_v9, %v479_v5  ;;  %v558_v17 = vadd.f32 %v542_v10, %v483_v6  ;;  %v525_v18 = vmax.f32 %v509_v11, 0.0  ;;  %v527_v19 = vmax.f32 %v511_v12, 0.0  ;;  %v500_v12 = vld [vmem:[%s1152_s2 + $0xd0] sm:$0xff] }
 0x1dc   :  { %v415_v22 = vpop.f32.mrb[4].mxu1 }
 0x1dd   :  { %572 = vst [vmem:[%s1153_s4 + $0x10] sm:$0xff] %v556_v16  ;;  %574 = vst [vmem:[%s1153_s4 + $0x20] sm:$0xff] %v558_v17  ;;  %v541_v23 = vmul.f32 %v525_v18, %v399_v13  ;;  %v543_v24 = vmul.f32 %v527_v19, %v411_v14  ;;  %v512_v25 = vadd.f32 %v486_v15, %v415_v22  ;;  %v417_v26 = vpop.f32.mrb[5].mxu1  ;;  %v499_v15 = vld [vmem:[%s1152_s2 + $0xc8] sm:$0xff] }
 0x1df   :  { %v557_v28 = vadd.f32 %v541_v23, %v481_v20  ;;  %v559_v29 = vadd.f32 %v543_v24, %v485_v21  ;;  %v528_v30 = vmax.f32 %v512_v25, 0.0  ;;  %v502_v20 = vld [vmem:[%s1152_s2 + $0xe0] sm:$0xff]  ;;  %v501_v23 = vld [vmem:[%s1152_s2 + $0xd8] sm:$0xff] }
 0x1e0   :  { %v421_v32 = vpop.f32.mrb[6].mxu1 }
 0x1e1   :  { %573 = vst [vmem:[%s1153_s4 + $0x18] sm:$0xff] %v557_v28  ;;  %575 = vst [vmem:[%s1153_s4 + $0x28] sm:$0xff] %v559_v29  ;;  %v544_v33 = vmul.f32 %v528_v30, %v417_v26  ;;  %v513_v34 = vadd.f32 %v488_v27, %v421_v32  ;;  %v423_v35 = vpop.f32.mrb[7].mxu1  ;;  %v504_v28 = vld [vmem:[%s1152_s2 + $0xf0] sm:$0xff] }
 0x1e3   :  { %v560_v37 = vadd.f32 %v544_v33, %v487_v31  ;;  %v529_v38 = vmax.f32 %v513_v34, 0.0  ;;  %v503_v31 = vld [vmem:[%s1152_s2 + $0xe8] sm:$0xff] }
 0x1e4   :  { %v427_v40 = vpop.f32.mrb[8].mxu1 }
 0x1e5   :  { %576 = vst [vmem:[%s1153_s4 + $0x30] sm:$0xff] %v560_v37  ;;  %v545_v41 = vmul.f32 %v529_v38, %v423_v35  ;;  %v514_v42 = vadd.f32 %v490_v36, %v427_v40  ;;  %v429_v43 = vpop.f32.mrb[9].mxu1  ;;  %v505_v38 = vld [vmem:[%s1152_s2 + $0xf8] sm:$0xff] }
 0x1e7   :  { %v561_v45 = vadd.f32 %v545_v41, %v489_v39  ;;  %v530_v46 = vmax.f32 %v514_v42, 0.0 }
 0x1e8   :  { %v433_v48 = vpop.f32.mrb[10].mxu1 }
 0x1e9   :  { %577 = vst [vmem:[%s1153_s4 + $0x38] sm:$0xff] %v561_v45  ;;  %v546_v49 = vmul.f32 %v530_v46, %v429_v43  ;;  %v515_v50 = vadd.f32 %v492_v44, %v433_v48  ;;  %v435_v51 = vpop.f32.mrb[11].mxu1 }
 0x1eb   :  { %v562_v53 = vadd.f32 %v546_v49, %v491_v47  ;;  %v531_v54 = vmax.f32 %v515_v50, 0.0 }
 0x1ec   :  { %v439_v56 = vpop.f32.mrb[12].mxu1 }
 0x1ed   :  { %578 = vst [vmem:[%s1153_s4 + $0x40] sm:$0xff] %v562_v53  ;;  %v547_v57 = vmul.f32 %v531_v54, %v435_v51  ;;  %v516_v58 = vadd.f32 %v494_v52, %v439_v56  ;;  %v441_v59 = vpop.f32.mrb[13].mxu1 }
 0x1ef   :  { %v563_v61 = vadd.f32 %v547_v57, %v493_v55  ;;  %v532_v62 = vmax.f32 %v516_v58, 0.0 }
 0x1f0   :  { %v445_v0 = vpop.f32.mrb[14].mxu1 }
 0x1f1   :  { %579 = vst [vmem:[%s1153_s4 + $0x48] sm:$0xff] %v563_v61  ;;  %v548_v1 = vmul.f32 %v532_v62, %v441_v59  ;;  %v517_v2 = vadd.f32 %v496_v60, %v445_v0  ;;  %v447_v3 = vpop.f32.mrb[15].mxu1 }
 0x1f3   :  { %v564_v5 = vadd.f32 %v548_v1, %v495_v63  ;;  %v533_v6 = vmax.f32 %v517_v2, 0.0 }
 0x1f4   :  { %v451_v8 = vpop.f32.mrb[16].mxu1 }
 0x1f5   :  { %580 = vst [vmem:[%s1153_s4 + $0x50] sm:$0xff] %v564_v5  ;;  %v549_v9 = vmul.f32 %v533_v6, %v447_v3  ;;  %v518_v10 = vadd.f32 %v498_v4, %v451_v8  ;;  %v453_v11 = vpop.f32.mrb[17].mxu1 }
 0x1f7   :  { %v565_v13 = vadd.f32 %v549_v9, %v497_v7  ;;  %v534_v14 = vmax.f32 %v518_v10, 0.0 }
 0x1f8   :  { %v457_v16 = vpop.f32.mrb[18].mxu1 }
 0x1f9   :  { %581 = vst [vmem:[%s1153_s4 + $0x58] sm:$0xff] %v565_v13  ;;  %v550_v17 = vmul.f32 %v534_v14, %v453_v11  ;;  %v519_v18 = vadd.f32 %v500_v12, %v457_v16  ;;  %v459_v19 = vpop.f32.mrb[19].mxu1 }
 0x1fb   :  { %v566_v21 = vadd.f32 %v550_v17, %v499_v15  ;;  %v535_v22 = vmax.f32 %v519_v18, 0.0 }
 0x1fc   :  { %v463_v24 = vpop.f32.mrb[20].mxu1 }
 0x1fd   :  { %582 = vst [vmem:[%s1153_s4 + $0x60] sm:$0xff] %v566_v21  ;;  %v551_v25 = vmul.f32 %v535_v22, %v459_v19  ;;  %v520_v26 = vadd.f32 %v502_v20, %v463_v24  ;;  %v465_v27 = vpop.f32.mrb[21].mxu1 }
 0x1ff   :  { %v567_v29 = vadd.f32 %v551_v25, %v501_v23  ;;  %v536_v30 = vmax.f32 %v520_v26, 0.0 }
 0x200   :  { %v469_v32 = vpop.f32.mrb[22].mxu1 }
 0x201   :  { %583 = vst [vmem:[%s1153_s4 + $0x68] sm:$0xff] %v567_v29  ;;  %v552_v33 = vmul.f32 %v536_v30, %v465_v27  ;;  %v521_v34 = vadd.f32 %v504_v28, %v469_v32  ;;  %v471_v35 = vpop.f32.mrb[23].mxu1 }
 0x203   :  { %v568_v36 = vadd.f32 %v552_v33, %v503_v31  ;;  %v537_v37 = vmax.f32 %v521_v34, 0.0 }
 0x205   :  { %584 = vst [vmem:[%s1153_s4 + $0x70] sm:$0xff] %v568_v36  ;;  %v553_v39 = vmul.f32 %v537_v37, %v471_v35 }
 0x207   :  { %v569_v40 = vadd.f32 %v553_v39, %v505_v38 }
 0x209   :  { %585 = vst [vmem:[%s1153_s4 + $0x78] sm:$0xff] %v569_v40 }

</bundles_post_ra>
